<compile_context>
chip_gen: v7x
topology: tpu7x:2x2x1
jax: 0.10.0
libtpu: 0.0.40
codegen_flags: <defaults>
</compile_context>

<pallas_src>
import functools

import jax
import jax.numpy as jnp
from jax.experimental import pallas as pl
from jax.experimental.pallas import tpu as pltpu

LANE = 128


def _round_up(x, m):
    return ((x + m - 1) // m) * m


def _pad2(x, rows, cols):
    return jnp.pad(x, ((0, rows - x.shape[0]), (0, cols - x.shape[1])))


def _vmem_limit_bytes():
    """~75% of the physical VMEM of the chip we are on (v5e/v6e: 128 MiB,
    v7x: 64 MiB).  Falls back to a v7x-safe 48 MiB if the query fails."""
    cap = 64 << 20
    try:
        info = pltpu.get_tpu_info()
        cap = getattr(info, "vmem_capacity_bytes", None) or cap
    except Exception:
        pass
    return int(cap) * 3 // 4


def hybrid_fusion_kernel(hidden_ref, rf_prob_ref,
                         w1_ref, b1_ref, w2_ref, b2_ref,
                         wa1_ref, ba1_ref, wa2_ref, ba2_ref,
                         wfc_t_ref, wfc_r_ref, bfc_ref,
                         out_ref, acc_ref, *, slab, inv_seq_len):
    sj = pl.program_id(1)
    tb, ts, d = hidden_ref.shape

    # ---- init partial-sum accumulator on first seq tile --------------------
    @pl.when(sj == 0)
    def _init():
        acc_ref[...] = jnp.zeros_like(acc_ref)

    # ---- hot loop: per-slab bf16->f32 widen + sublane-preserving partial
    # sums.  acc is [TB, 8, D]; summing over the slab//8 axis is vreg-wise
    # (pure VPU), so the streamed loop is vld + vadd only and hides entirely
    # under the hidden DMA.  The widened f32 temp never exceeds one slab.
    for c in range(ts // slab):
        chunk = hidden_ref[:, pl.ds(c * slab, slab), :].astype(jnp.float32)
        acc_ref[...] += chunk.reshape(tb, slab // 8, 8, d).sum(axis=1)

    # ---- finalize once per batch tile: 8-way sublane (XLU) reduce + mean
    # + full FusionLayer MLP (cold path) --------------------------------------
    @pl.when(sj == pl.num_programs(1) - 1)
    def _finalize():
        trans_mean = jnp.sum(acc_ref[...], axis=1) * inv_seq_len        # [TB, D]

        # trans_adjust: Linear(D, D//2) -> ReLU -> Dropout(id) -> Linear(., Cp)
        h = jnp.dot(trans_mean, w1_ref[...],
                    preferred_element_type=jnp.float32) + b1_ref[...]
        h = jnp.maximum(h, 0.0)
        t = jnp.dot(h, w2_ref[...],
                    preferred_element_type=jnp.float32) + b2_ref[...]   # [TB, Cp]

        # attention gate: Linear -> ReLU -> Linear ; wa2/ba2 are lane-
        # replicated in the wrapper, so `a` already holds the scalar gate
        # broadcast across all Cp lanes (no narrow [TB, 1] intermediate).
        ha = jnp.dot(t, wa1_ref[...],
                     preferred_element_type=jnp.float32) + ba1_ref[...]
        ha = jnp.maximum(ha, 0.0)
        a = jnp.dot(ha, wa2_ref[...],
                    preferred_element_type=jnp.float32) + ba2_ref[...]  # [TB, Cp]
        alpha = jax.nn.sigmoid(a)

        # fused = cat([alpha*t, (1-alpha)*rf_prob], 1); out = fc(fused)
        # (concat avoided by splitting the fc weight into wfc_t / wfc_r)
        left = alpha * t
        right = (1.0 - alpha) * rf_prob_ref[...]
        out = (jnp.dot(left, wfc_t_ref[...], preferred_element_type=jnp.float32)
               + jnp.dot(right, wfc_r_ref[...], preferred_element_type=jnp.float32)
               + bfc_ref[...])
        out_ref[...] = out.astype(out_ref.dtype)


def hybrid_forward(hidden, rf_prob, params, *, tb=None, ts=None,
                   vmem_limit_bytes=None):
    """hidden: [B, S, D] (bf16 or f32; streamed as bf16), rf_prob: [B, C] f32
    -> [B, C] f32."""
    B, S, D = hidden.shape
    C = rf_prob.shape[1]
    H1 = params["w1"].shape[1]
    C2 = params["wa1"].shape[1]

    # Stream hidden as bf16: the kernel is HBM-bandwidth-bound on the seq-sum,
    # so halving the streamed bytes is the dominant win.  f32 accumulation.
    if hidden.dtype != jnp.bfloat16:
        hidden = hidden.astype(jnp.bfloat16)
    elt = 2

    if vmem_limit_bytes is None:
        vmem_limit_bytes = _vmem_limit_bytes()

    # lane-dense padding of the tiny class-sized dims
    Cp = _round_up(C, LANE)
    C2p = _round_up(C2, LANE)

    # ---- batch tile: multiple of 8; keep >= 2 batch tiles when the batch is
    # big enough so both v7x TensorCores get work on the "parallel" axis.
    Bp = _round_up(B, 8)
    TB = 8 if tb is None else _round_up(max(tb, 8), 8)
    if Bp >= 16:
        TB = min(TB, max(8, (Bp // 2) // 8 * 8))
    TB = min(TB, Bp)
    Bp = _round_up(B, TB)

    # ---- seq tile: as large as the per-chip VMEM budget allows, targeting
    # ~16 MB per hidden block so the ~0.35us per-grid-step overhead amortizes.
    Sp = _round_up(S, 16)                       # bf16 sublane tile = 16 rows
    w_elems = (D * H1 + H1 + H1 * Cp + Cp + Cp * C2p + C2p
               + C2p * Cp + Cp + 2 * Cp * Cp + Cp)
    resident = 2 * 4 * w_elems                  # weights (worst case 2 buffers)
    resident += 4 * (TB * 8 * D + 2 * TB * Cp)  # acc scratch + out + rf
    headroom = 8 << 20                          # slab widen temp + internals
    budget = max(int(vmem_limit_bytes) - resident - headroom, 4 << 20)
    ts_cap = min(budget // 2, 16 << 20) // (TB * D * elt)   # double-buffered
    if ts is not None:
        ts_cap = min(ts_cap, ts)
    ts_cap = max(16, int(ts_cap))
    if ts_cap >= 128 and Sp > 128:
        TS = min((ts_cap // 128) * 128, _round_up(Sp, 128))
        SLAB = 128
    else:
        TS = min((ts_cap // 16) * 16, Sp)
        SLAB = TS
    Sp = _round_up(Sp, TS)

    hidden_p = jnp.pad(hidden, ((0, Bp - B), (0, Sp - S), (0, 0)))
    rf_p = _pad2(rf_prob.astype(jnp.float32), Bp, Cp)

    # zero-pad weights/biases to the lane-dense widths; replicate the
    # attention-gate output column so alpha is computed lane-broadcast.
    w1 = params["w1"]                                   # [D, H1]
    b1 = params["b1"]                                   # [1, H1]
    w2 = _pad2(params["w2"], H1, Cp)
    b2 = _pad2(params["b2"], 1, Cp)
    wa1 = _pad2(params["wa1"], Cp, C2p)
    ba1 = _pad2(params["ba1"], 1, C2p)
    wa2 = jnp.tile(_pad2(params["wa2"], C2p, 1), (1, Cp))
    ba2 = jnp.tile(params["ba2"], (1, Cp))
    wfc_t = _pad2(params["wfc_t"], Cp, Cp)
    wfc_r = _pad2(params["wfc_r"], Cp, Cp)
    bfc = _pad2(params["bfc"], 1, Cp)

    weights = (w1, b1, w2, b2, wa1, ba1, wa2, ba2, wfc_t, wfc_r, bfc)

    grid = (Bp // TB, Sp // TS)

    kernel = functools.partial(hybrid_fusion_kernel, slab=SLAB,
                               inv_seq_len=1.0 / S)   # mean over the TRUE S

    # advisory cost: HBM-bandwidth-heavy, compute-light
    bytes_accessed = (hidden_p.size * elt + rf_p.size * 4 + Bp * Cp * 4
                      + sum(int(w.size) for w in weights) * 4)
    flops = (2 * Bp * Sp * D
             + 2 * Bp * (D * H1 + H1 * Cp + Cp * C2p + C2p * Cp + 2 * Cp * Cp))
    cost = pl.CostEstimate(flops=int(flops), transcendentals=int(Bp * Cp),
                           bytes_accessed=int(bytes_accessed))

    def _call(single_buffer_weights):
        def const_spec(x):
            # grid-invariant weights: the 2nd pipeline buffer is pure VMEM
            # waste, so request single buffering when the build supports it.
            if single_buffer_weights:
                return pl.BlockSpec(x.shape, lambda i, j: (0, 0),
                                    pipeline_mode=pl.Buffered(1))
            return pl.BlockSpec(x.shape, lambda i, j: (0, 0))

        return pl.pallas_call(
            kernel,
            out_shape=jax.ShapeDtypeStruct((Bp, Cp), jnp.float32),
            grid_spec=pltpu.PrefetchScalarGridSpec(
                num_scalar_prefetch=0,
                grid=grid,
                in_specs=[
                    pl.BlockSpec((TB, TS, D), lambda i, j: (i, j, 0)),  # hidden
                    pl.BlockSpec((TB, Cp), lambda i, j: (i, 0)),        # rf_prob
                ] + [const_spec(w) for w in weights],
                out_specs=pl.BlockSpec((TB, Cp), lambda i, j: (i, 0)),
                scratch_shapes=[pltpu.VMEM((TB, 8, D), jnp.float32)],   # partial seq-sum
            ),
            compiler_params=pltpu.CompilerParams(
                dimension_semantics=("parallel", "arbitrary"),
                vmem_limit_bytes=int(vmem_limit_bytes),
            ),
            cost_estimate=cost,
        )(hidden_p, rf_p, *weights)

    try:
        out = _call(True)
    except Exception:
        # older builds without BlockSpec(pipeline_mode=...): default buffering
        out = _call(False)

    return out[:B, :C]


def _linear_params(key, fan_in, fan_out):
    """PyTorch nn.Linear default init: U(-k, k), k = 1/sqrt(fan_in).
    Returns (W [fan_in, fan_out], b [1, fan_out]) in JAX (x @ W + b) layout."""
    k = 1.0 / jnp.sqrt(jnp.float32(fan_in))
    kw, kb = jax.random.split(key)
    w = jax.random.uniform(kw, (fan_in, fan_out), jnp.float32, -k, k)
    b = jax.random.uniform(kb, (1, fan_out), jnp.float32, -k, k)
    return w, b


def init_params(key, trans_dim, num_classes):
    ks = jax.random.split(key, 5)
    w1, b1 = _linear_params(ks[0], trans_dim, trans_dim // 2)
    w2, b2 = _linear_params(ks[1], trans_dim // 2, num_classes)
    wa1, ba1 = _linear_params(ks[2], num_classes, num_classes // 2)
    wa2, ba2 = _linear_params(ks[3], num_classes // 2, 1)
    wfc, bfc = _linear_params(ks[4], num_classes * 2, num_classes)
    return {
        "w1": w1, "b1": b1, "w2": w2, "b2": b2,
        "wa1": wa1, "ba1": ba1, "wa2": wa2, "ba2": ba2,
        "wfc_t": wfc[:num_classes, :], "wfc_r": wfc[num_classes:, :],
        "bfc": bfc,
    }


def reference_forward(hidden, rf_prob, p):
    """Pure-JAX reference of the same forward pass (for validation)."""
    t = jnp.mean(hidden.astype(jnp.float32), axis=1)
    t = jnp.maximum(t @ p["w1"] + p["b1"], 0.0) @ p["w2"] + p["b2"]
    ha = jnp.maximum(t @ p["wa1"] + p["ba1"], 0.0)
    alpha = jax.nn.sigmoid(ha @ p["wa2"] + p["ba2"])
    fused = jnp.concatenate([alpha * t, (1.0 - alpha) * rf_prob], axis=1)
    wfc = jnp.concatenate([p["wfc_t"], p["wfc_r"]], axis=0)
    return fused @ wfc + p["bfc"]


if __name__ == "__main__":
    B, S, D, C = 2, 8, 32, 8   # batch, seq, trans_dim, num_classes

    key = jax.random.PRNGKey(0)
    k_hidden, k_rf, k_params = jax.random.split(key, 3)

    # Stand-in for BERT last hidden state [B, S, D], streamed as bf16
    hidden = jax.random.normal(k_hidden, (B, S, D), jnp.float32).astype(jnp.bfloat16)
    # Stand-in for RF predict_proba output [B, C] (rows sum to 1)
    rf_logits = jax.random.normal(k_rf, (B, C), jnp.float32)
    rf_prob = jax.nn.softmax(rf_logits, axis=-1)

    params = init_params(k_params, D, C)

    out = hybrid_forward(hidden, rf_prob, params)
    out = jax.block_until_ready(out)

    # reference sees the SAME bf16-quantized hidden, so 1e-4 tolerance holds
    ref = reference_forward(hidden, rf_prob, params)
    assert out.shape == (B, C)
    assert jnp.allclose(out, ref, atol=1e-4, rtol=1e-4)

    print("KERNEL_OK")
</pallas_src>

<mosaic_0001>
module attributes {stable_mosaic.version = 11 : i64} {
  func.func @hybrid_fusion_kernel(%arg0: i32, %arg1: i32, %arg2: memref<8x16x32xbf16, #tpu.memory_space<vmem>>, %arg3: memref<8x128xf32, #tpu.memory_space<vmem>>, %arg4: memref<32x16xf32, #tpu.memory_space<vmem>>, %arg5: memref<1x16xf32, #tpu.memory_space<vmem>>, %arg6: memref<16x128xf32, #tpu.memory_space<vmem>>, %arg7: memref<1x128xf32, #tpu.memory_space<vmem>>, %arg8: memref<128x128xf32, #tpu.memory_space<vmem>>, %arg9: memref<1x128xf32, #tpu.memory_space<vmem>>, %arg10: memref<128x128xf32, #tpu.memory_space<vmem>>, %arg11: memref<1x128xf32, #tpu.memory_space<vmem>>, %arg12: memref<128x128xf32, #tpu.memory_space<vmem>>, %arg13: memref<128x128xf32, #tpu.memory_space<vmem>>, %arg14: memref<1x128xf32, #tpu.memory_space<vmem>>, %arg15: memref<8x128xf32, #tpu.memory_space<vmem>>, %arg16: memref<8x8x32xf32, #tpu.memory_space<vmem>>) attributes {dimension_semantics = [#tpu.dimension_semantics<parallel>, #tpu.dimension_semantics<arbitrary>], iteration_bounds = array<i64: 1, 1>, scalar_prefetch = 0 : i64, scratch_operands = 1 : i64, tpu.core_type = #tpu.core_type<tc>, window_params = [{transform_indices = @transform_0, window_bounds = array<i64: 8, 16, 32>}, {transform_indices = @transform_1, window_bounds = array<i64: 8, 128>}, {pipeline_mode = #tpu.pipeline_mode<synchronous>, transform_indices = @transform_2, window_bounds = array<i64: 32, 16>}, {pipeline_mode = #tpu.pipeline_mode<synchronous>, transform_indices = @transform_3, window_bounds = array<i64: 1, 16>}, {pipeline_mode = #tpu.pipeline_mode<synchronous>, transform_indices = @transform_4, window_bounds = array<i64: 16, 128>}, {pipeline_mode = #tpu.pipeline_mode<synchronous>, transform_indices = @transform_5, window_bounds = array<i64: 1, 128>}, {pipeline_mode = #tpu.pipeline_mode<synchronous>, transform_indices = @transform_6, window_bounds = array<i64: 128, 128>}, {pipeline_mode = #tpu.pipeline_mode<synchronous>, transform_indices = @transform_7, window_bounds = array<i64: 1, 128>}, {pipeline_mode = #tpu.pipeline_mode<synchronous>, transform_indices = @transform_8, window_bounds = array<i64: 128, 128>}, {pipeline_mode = #tpu.pipeline_mode<synchronous>, transform_indices = @transform_9, window_bounds = array<i64: 1, 128>}, {pipeline_mode = #tpu.pipeline_mode<synchronous>, transform_indices = @transform_10, window_bounds = array<i64: 128, 128>}, {pipeline_mode = #tpu.pipeline_mode<synchronous>, transform_indices = @transform_11, window_bounds = array<i64: 128, 128>}, {pipeline_mode = #tpu.pipeline_mode<synchronous>, transform_indices = @transform_12, window_bounds = array<i64: 1, 128>}, {transform_indices = @transform_13, window_bounds = array<i64: 8, 128>}]} {
    %c0_i32 = arith.constant 0 : i32
    %0 = arith.cmpi eq, %arg1, %c0_i32 : i32
    %1 = arith.extui %0 : i1 to i32
    %c0_i32_0 = arith.constant 0 : i32
    %2 = arith.cmpi ne, %1, %c0_i32_0 : i32
    scf.if %2 {
      %cst_11 = arith.constant 0.000000e+00 : f32
      %13 = vector.broadcast %cst_11 : f32 to vector<8x8x32xf32>
      %c0_12 = arith.constant 0 : index
      %c0_13 = arith.constant 0 : index
      %c0_14 = arith.constant 0 : index
      %14 = vector.load %arg16[%c0_12, %c0_13, %c0_14] : memref<8x8x32xf32, #tpu.memory_space<vmem>>, vector<8x8x32xf32>
      tpu.vector_store %arg16[%c0_12, %c0_13, %c0_14], %13 {strides = array<i32>} : memref<8x8x32xf32, #tpu.memory_space<vmem>>, vector<8x8x32xf32>,
    } else {
    }
    %c0 = arith.constant 0 : index
    %c0_1 = arith.constant 0 : index
    %c0_2 = arith.constant 0 : index
    %3 = vector.load %arg2[%c0, %c0_1, %c0_2] : memref<8x16x32xbf16, #tpu.memory_space<vmem>>, vector<8x16x32xbf16>
    %4 = arith.extf %3 : vector<8x16x32xbf16> to vector<8x16x32xf32>
    %c0_3 = arith.constant 0 : index
    %c0_4 = arith.constant 0 : index
    %c0_5 = arith.constant 0 : index
    %5 = vector.load %arg16[%c0_3, %c0_4, %c0_5] : memref<8x8x32xf32, #tpu.memory_space<vmem>>, vector<8x8x32xf32>
    %6 = vector.shape_cast %4 : vector<8x16x32xf32> to vector<8x2x8x32xf32>
    %cst = arith.constant dense<0.000000e+00> : vector<8x8x32xf32>
    %7 = vector.multi_reduction <add>, %6, %cst [1] : vector<8x2x8x32xf32> to vector<8x8x32xf32>
    %8 = arith.addf %5, %7 : vector<8x8x32xf32>
    %c0_6 = arith.constant 0 : index
    %c0_7 = arith.constant 0 : index
    %c0_8 = arith.constant 0 : index
    %9 = vector.load %arg16[%c0_6, %c0_7, %c0_8] : memref<8x8x32xf32, #tpu.memory_space<vmem>>, vector<8x8x32xf32>
    tpu.vector_store %arg16[%c0_6, %c0_7, %c0_8], %8 {strides = array<i32>} : memref<8x8x32xf32, #tpu.memory_space<vmem>>, vector<8x8x32xf32>,
    %c0_i32_9 = arith.constant 0 : i32
    %10 = arith.cmpi eq, %arg1, %c0_i32_9 : i32
    %11 = arith.extui %10 : i1 to i32
    %c0_i32_10 = arith.constant 0 : i32
    %12 = arith.cmpi ne, %11, %c0_i32_10 : i32
    scf.if %12 {
      %c0_11 = arith.constant 0 : index
      %c0_12 = arith.constant 0 : index
      %c0_13 = arith.constant 0 : index
      %13 = vector.load %arg16[%c0_11, %c0_12, %c0_13] : memref<8x8x32xf32, #tpu.memory_space<vmem>>, vector<8x8x32xf32>
      %cst_14 = arith.constant dense<0.000000e+00> : vector<8x32xf32>
      %14 = vector.multi_reduction <add>, %13, %cst_14 [1] : vector<8x8x32xf32> to vector<8x32xf32>
      %cst_15 = arith.constant 1.250000e-01 : f32
      %15 = vector.broadcast %cst_15 : f32 to vector<8x32xf32>
      %16 = arith.mulf %14, %15 : vector<8x32xf32>
      %c0_16 = arith.constant 0 : index
      %c0_17 = arith.constant 0 : index
      %17 = vector.load %arg4[%c0_16, %c0_17] : memref<32x16xf32, #tpu.memory_space<vmem>>, vector<32x16xf32>
      %cst_18 = arith.constant dense<0.000000e+00> : vector<8x16xf32>
      %18 = tpu.matmul %16, %17, %cst_18 {dimension_numbers = #tpu.dot_dimension_numbers<[1], [0], [0], [1], [0, 0, 1, 1], [], []>} : vector<8x32xf32>, vector<32x16xf32>, vector<8x16xf32> -> vector<8x16xf32>
      %c0_19 = arith.constant 0 : index
      %c0_20 = arith.constant 0 : index
      %19 = vector.load %arg5[%c0_19, %c0_20] : memref<1x16xf32, #tpu.memory_space<vmem>>, vector<1x16xf32>
      %20 = vector.broadcast %19 : vector<1x16xf32> to vector<8x16xf32>
      %21 = arith.addf %18, %20 : vector<8x16xf32>
      %cst_21 = arith.constant 0.000000e+00 : f32
      %22 = vector.broadcast %cst_21 : f32 to vector<8x16xf32>
      %23 = arith.maximumf %21, %22 : vector<8x16xf32>
      %c0_22 = arith.constant 0 : index
      %c0_23 = arith.constant 0 : index
      %24 = vector.load %arg6[%c0_22, %c0_23] : memref<16x128xf32, #tpu.memory_space<vmem>>, vector<16x128xf32>
      %cst_24 = arith.constant dense<0.000000e+00> : vector<8x128xf32>
      %25 = tpu.matmul %23, %24, %cst_24 {dimension_numbers = #tpu.dot_dimension_numbers<[1], [0], [0], [1], [0, 0, 1, 1], [], []>} : vector<8x16xf32>, vector<16x128xf32>, vector<8x128xf32> -> vector<8x128xf32>
      %c0_25 = arith.constant 0 : index
      %c0_26 = arith.constant 0 : index
      %26 = vector.load %arg7[%c0_25, %c0_26] : memref<1x128xf32, #tpu.memory_space<vmem>>, vector<1x128xf32>
      %27 = vector.broadcast %26 : vector<1x128xf32> to vector<8x128xf32>
      %28 = arith.addf %25, %27 : vector<8x128xf32>
      %c0_27 = arith.constant 0 : index
      %c0_28 = arith.constant 0 : index
      %29 = vector.load %arg8[%c0_27, %c0_28] : memref<128x128xf32, #tpu.memory_space<vmem>>, vector<128x128xf32>
      %cst_29 = arith.constant dense<0.000000e+00> : vector<8x128xf32>
      %30 = tpu.matmul %28, %29, %cst_29 {dimension_numbers = #tpu.dot_dimension_numbers<[1], [0], [0], [1], [0, 0, 1, 1], [], []>} : vector<8x128xf32>, vector<128x128xf32>, vector<8x128xf32> -> vector<8x128xf32>
      %c0_30 = arith.constant 0 : index
      %c0_31 = arith.constant 0 : index
      %31 = vector.load %arg9[%c0_30, %c0_31] : memref<1x128xf32, #tpu.memory_space<vmem>>, vector<1x128xf32>
      %32 = vector.broadcast %31 : vector<1x128xf32> to vector<8x128xf32>
      %33 = arith.addf %30, %32 : vector<8x128xf32>
      %cst_32 = arith.constant 0.000000e+00 : f32
      %34 = vector.broadcast %cst_32 : f32 to vector<8x128xf32>
      %35 = arith.maximumf %33, %34 : vector<8x128xf32>
      %c0_33 = arith.constant 0 : index
      %c0_34 = arith.constant 0 : index
      %36 = vector.load %arg10[%c0_33, %c0_34] : memref<128x128xf32, #tpu.memory_space<vmem>>, vector<128x128xf32>
      %cst_35 = arith.constant dense<0.000000e+00> : vector<8x128xf32>
      %37 = tpu.matmul %35, %36, %cst_35 {dimension_numbers = #tpu.dot_dimension_numbers<[1], [0], [0], [1], [0, 0, 1, 1], [], []>} : vector<8x128xf32>, vector<128x128xf32>, vector<8x128xf32> -> vector<8x128xf32>
      %c0_36 = arith.constant 0 : index
      %c0_37 = arith.constant 0 : index
      %38 = vector.load %arg11[%c0_36, %c0_37] : memref<1x128xf32, #tpu.memory_space<vmem>>, vector<1x128xf32>
      %39 = vector.broadcast %38 : vector<1x128xf32> to vector<8x128xf32>
      %40 = arith.addf %37, %39 : vector<8x128xf32>
      %41 = arith.negf %40 : vector<8x128xf32>
      %42 = math.exp %41 : vector<8x128xf32>
      %cst_38 = arith.constant 1.000000e+00 : f32
      %43 = vector.broadcast %cst_38 : f32 to vector<8x128xf32>
      %44 = arith.addf %43, %42 : vector<8x128xf32>
      %45 = arith.divf %43, %44 : vector<8x128xf32>
      %46 = arith.mulf %45, %28 : vector<8x128xf32>
      %cst_39 = arith.constant 1.000000e+00 : f32
      %47 = vector.broadcast %cst_39 : f32 to vector<8x128xf32>
      %48 = arith.subf %47, %45 : vector<8x128xf32>
      %c0_40 = arith.constant 0 : index
      %c0_41 = arith.constant 0 : index
      %49 = vector.load %arg3[%c0_40, %c0_41] : memref<8x128xf32, #tpu.memory_space<vmem>>, vector<8x128xf32>
      %50 = arith.mulf %48, %49 : vector<8x128xf32>
      %c0_42 = arith.constant 0 : index
      %c0_43 = arith.constant 0 : index
      %51 = vector.load %arg12[%c0_42, %c0_43] : memref<128x128xf32, #tpu.memory_space<vmem>>, vector<128x128xf32>
      %cst_44 = arith.constant dense<0.000000e+00> : vector<8x128xf32>
      %52 = tpu.matmul %46, %51, %cst_44 {dimension_numbers = #tpu.dot_dimension_numbers<[1], [0], [0], [1], [0, 0, 1, 1], [], []>} : vector<8x128xf32>, vector<128x128xf32>, vector<8x128xf32> -> vector<8x128xf32>
      %c0_45 = arith.constant 0 : index
      %c0_46 = arith.constant 0 : index
      %53 = vector.load %arg13[%c0_45, %c0_46] : memref<128x128xf32, #tpu.memory_space<vmem>>, vector<128x128xf32>
      %cst_47 = arith.constant dense<0.000000e+00> : vector<8x128xf32>
      %54 = tpu.matmul %50, %53, %cst_47 {dimension_numbers = #tpu.dot_dimension_numbers<[1], [0], [0], [1], [0, 0, 1, 1], [], []>} : vector<8x128xf32>, vector<128x128xf32>, vector<8x128xf32> -> vector<8x128xf32>
      %55 = arith.addf %52, %54 : vector<8x128xf32>
      %c0_48 = arith.constant 0 : index
      %c0_49 = arith.constant 0 : index
      %56 = vector.load %arg14[%c0_48, %c0_49] : memref<1x128xf32, #tpu.memory_space<vmem>>, vector<1x128xf32>
      %57 = vector.broadcast %56 : vector<1x128xf32> to vector<8x128xf32>
      %58 = arith.addf %55, %57 : vector<8x128xf32>
      %c0_50 = arith.constant 0 : index
      %c0_51 = arith.constant 0 : index
      %59 = vector.load %arg15[%c0_50, %c0_51] : memref<8x128xf32, #tpu.memory_space<vmem>>, vector<8x128xf32>
      tpu.vector_store %arg15[%c0_50, %c0_51], %58 {strides = array<i32>} : memref<8x128xf32, #tpu.memory_space<vmem>>, vector<8x128xf32>,
    } else {
    }
    return
  }
  func.func @transform_0(%arg0: i32, %arg1: i32) -> (i32, i32, i32) {
    %c0_i32 = arith.constant 0 : i32
    %c0_i32_0 = arith.constant 0 : i32
    return %arg0, %arg1, %c0_i32 : i32, i32, i32
  }
  func.func @transform_1(%arg0: i32, %arg1: i32) -> (i32, i32) {
    %c0_i32 = arith.constant 0 : i32
    %c0_i32_0 = arith.constant 0 : i32
    return %arg0, %c0_i32 : i32, i32
  }
  func.func @transform_2(%arg0: i32, %arg1: i32) -> (i32, i32) {
    %c0_i32 = arith.constant 0 : i32
    %c0_i32_0 = arith.constant 0 : i32
    %c0_i32_1 = arith.constant 0 : i32
    return %c0_i32, %c0_i32_0 : i32, i32
  }
  func.func @transform_3(%arg0: i32, %arg1: i32) -> (i32, i32) {
    %c0_i32 = arith.constant 0 : i32
    %c0_i32_0 = arith.constant 0 : i32
    %c0_i32_1 = arith.constant 0 : i32
    return %c0_i32, %c0_i32_0 : i32, i32
  }
  func.func @transform_4(%arg0: i32, %arg1: i32) -> (i32, i32) {
    %c0_i32 = arith.constant 0 : i32
    %c0_i32_0 = arith.constant 0 : i32
    %c0_i32_1 = arith.constant 0 : i32
    return %c0_i32, %c0_i32_0 : i32, i32
  }
  func.func @transform_5(%arg0: i32, %arg1: i32) -> (i32, i32) {
    %c0_i32 = arith.constant 0 : i32
    %c0_i32_0 = arith.constant 0 : i32
    %c0_i32_1 = arith.constant 0 : i32
    return %c0_i32, %c0_i32_0 : i32, i32
  }
  func.func @transform_6(%arg0: i32, %arg1: i32) -> (i32, i32) {
    %c0_i32 = arith.constant 0 : i32
    %c0_i32_0 = arith.constant 0 : i32
    %c0_i32_1 = arith.constant 0 : i32
    return %c0_i32, %c0_i32_0 : i32, i32
  }
  func.func @transform_7(%arg0: i32, %arg1: i32) -> (i32, i32) {
    %c0_i32 = arith.constant 0 : i32
    %c0_i32_0 = arith.constant 0 : i32
    %c0_i32_1 = arith.constant 0 : i32
    return %c0_i32, %c0_i32_0 : i32, i32
  }
  func.func @transform_8(%arg0: i32, %arg1: i32) -> (i32, i32) {
    %c0_i32 = arith.constant 0 : i32
    %c0_i32_0 = arith.constant 0 : i32
    %c0_i32_1 = arith.constant 0 : i32
    return %c0_i32, %c0_i32_0 : i32, i32
  }
  func.func @transform_9(%arg0: i32, %arg1: i32) -> (i32, i32) {
    %c0_i32 = arith.constant 0 : i32
    %c0_i32_0 = arith.constant 0 : i32
    %c0_i32_1 = arith.constant 0 : i32
    return %c0_i32, %c0_i32_0 : i32, i32
  }
  func.func @transform_10(%arg0: i32, %arg1: i32) -> (i32, i32) {
    %c0_i32 = arith.constant 0 : i32
    %c0_i32_0 = arith.constant 0 : i32
    %c0_i32_1 = arith.constant 0 : i32
    return %c0_i32, %c0_i32_0 : i32, i32
  }
  func.func @transform_11(%arg0: i32, %arg1: i32) -> (i32, i32) {
    %c0_i32 = arith.constant 0 : i32
    %c0_i32_0 = arith.constant 0 : i32
    %c0_i32_1 = arith.constant 0 : i32
    return %c0_i32, %c0_i32_0 : i32, i32
  }
  func.func @transform_12(%arg0: i32, %arg1: i32) -> (i32, i32) {
    %c0_i32 = arith.constant 0 : i32
    %c0_i32_0 = arith.constant 0 : i32
    %c0_i32_1 = arith.constant 0 : i32
    return %c0_i32, %c0_i32_0 : i32, i32
  }
  func.func @transform_13(%arg0: i32, %arg1: i32) -> (i32, i32) {
    %c0_i32 = arith.constant 0 : i32
    %c0_i32_0 = arith.constant 0 : i32
    return %arg0, %c0_i32 : i32, i32
  }
}

module attributes {stable_mosaic.version = 11 : i64} {
  func.func @hybrid_fusion_kernel(%arg0: i32, %arg1: i32, %arg2: memref<8x16x32xbf16, #tpu.memory_space<vmem>>, %arg3: memref<8x128xf32, #tpu.memory_space<vmem>>, %arg4: memref<32x16xf32, #tpu.memory_space<vmem>>, %arg5: memref<1x16xf32, #tpu.memory_space<vmem>>, %arg6: memref<16x128xf32, #tpu.memory_space<vmem>>, %arg7: memref<1x128xf32, #tpu.memory_space<vmem>>, %arg8: memref<128x128xf32, #tpu.memory_space<vmem>>, %arg9: memref<1x128xf32, #tpu.memory_space<vmem>>, %arg10: memref<128x128xf32, #tpu.memory_space<vmem>>, %arg11: memref<1x128xf32, #tpu.memory_space<vmem>>, %arg12: memref<128x128xf32, #tpu.memory_space<vmem>>, %arg13: memref<128x128xf32, #tpu.memory_space<vmem>>, %arg14: memref<1x128xf32, #tpu.memory_space<vmem>>, %arg15: memref<8x128xf32, #tpu.memory_space<vmem>>, %arg16: memref<8x8x32xf32, #tpu.memory_space<vmem>>) attributes {dimension_semantics = [#tpu.dimension_semantics<parallel>, #tpu.dimension_semantics<arbitrary>], iteration_bounds = array<i64: 1, 1>, scalar_prefetch = 0 : i64, scratch_operands = 1 : i64, tpu.core_type = #tpu.core_type<tc>, window_params = [{transform_indices = @transform_0, window_bounds = array<i64: 8, 16, 32>}, {transform_indices = @transform_1, window_bounds = array<i64: 8, 128>}, {pipeline_mode = #tpu.pipeline_mode<synchronous>, transform_indices = @transform_2, window_bounds = array<i64: 32, 16>}, {pipeline_mode = #tpu.pipeline_mode<synchronous>, transform_indices = @transform_3, window_bounds = array<i64: 1, 16>}, {pipeline_mode = #tpu.pipeline_mode<synchronous>, transform_indices = @transform_4, window_bounds = array<i64: 16, 128>}, {pipeline_mode = #tpu.pipeline_mode<synchronous>, transform_indices = @transform_5, window_bounds = array<i64: 1, 128>}, {pipeline_mode = #tpu.pipeline_mode<synchronous>, transform_indices = @transform_6, window_bounds = array<i64: 128, 128>}, {pipeline_mode = #tpu.pipeline_mode<synchronous>, transform_indices = @transform_7, window_bounds = array<i64: 1, 128>}, {pipeline_mode = #tpu.pipeline_mode<synchronous>, transform_indices = @transform_8, window_bounds = array<i64: 128, 128>}, {pipeline_mode = #tpu.pipeline_mode<synchronous>, transform_indices = @transform_9, window_bounds = array<i64: 1, 128>}, {pipeline_mode = #tpu.pipeline_mode<synchronous>, transform_indices = @transform_10, window_bounds = array<i64: 128, 128>}, {pipeline_mode = #tpu.pipeline_mode<synchronous>, transform_indices = @transform_11, window_bounds = array<i64: 128, 128>}, {pipeline_mode = #tpu.pipeline_mode<synchronous>, transform_indices = @transform_12, window_bounds = array<i64: 1, 128>}, {transform_indices = @transform_13, window_bounds = array<i64: 8, 128>}]} {
    %c0_i32 = arith.constant 0 : i32
    %0 = arith.cmpi eq, %arg1, %c0_i32 : i32
    %1 = arith.extui %0 : i1 to i32
    %c0_i32_0 = arith.constant 0 : i32
    %2 = arith.cmpi ne, %1, %c0_i32_0 : i32
    scf.if %2 {
      %cst_11 = arith.constant 0.000000e+00 : f32
      %13 = vector.broadcast %cst_11 : f32 to vector<8x8x32xf32>
      %c0_12 = arith.constant 0 : index
      %c0_13 = arith.constant 0 : index
      %c0_14 = arith.constant 0 : index
      %14 = vector.load %arg16[%c0_12, %c0_13, %c0_14] : memref<8x8x32xf32, #tpu.memory_space<vmem>>, vector<8x8x32xf32>
      tpu.vector_store %arg16[%c0_12, %c0_13, %c0_14], %13 {strides = array<i32>} : memref<8x8x32xf32, #tpu.memory_space<vmem>>, vector<8x8x32xf32>,
    } else {
    }
    %c0 = arith.constant 0 : index
    %c0_1 = arith.constant 0 : index
    %c0_2 = arith.constant 0 : index
    %3 = vector.load %arg2[%c0, %c0_1, %c0_2] : memref<8x16x32xbf16, #tpu.memory_space<vmem>>, vector<8x16x32xbf16>
    %4 = arith.extf %3 : vector<8x16x32xbf16> to vector<8x16x32xf32>
    %c0_3 = arith.constant 0 : index
    %c0_4 = arith.constant 0 : index
    %c0_5 = arith.constant 0 : index
    %5 = vector.load %arg16[%c0_3, %c0_4, %c0_5] : memref<8x8x32xf32, #tpu.memory_space<vmem>>, vector<8x8x32xf32>
    %6 = vector.shape_cast %4 : vector<8x16x32xf32> to vector<8x2x8x32xf32>
    %cst = arith.constant dense<0.000000e+00> : vector<8x8x32xf32>
    %7 = vector.multi_reduction <add>, %6, %cst [1] : vector<8x2x8x32xf32> to vector<8x8x32xf32>
    %8 = arith.addf %5, %7 : vector<8x8x32xf32>
    %c0_6 = arith.constant 0 : index
    %c0_7 = arith.constant 0 : index
    %c0_8 = arith.constant 0 : index
    %9 = vector.load %arg16[%c0_6, %c0_7, %c0_8] : memref<8x8x32xf32, #tpu.memory_space<vmem>>, vector<8x8x32xf32>
    tpu.vector_store %arg16[%c0_6, %c0_7, %c0_8], %8 {strides = array<i32>} : memref<8x8x32xf32, #tpu.memory_space<vmem>>, vector<8x8x32xf32>,
    %c0_i32_9 = arith.constant 0 : i32
    %10 = arith.cmpi eq, %arg1, %c0_i32_9 : i32
    %11 = arith.extui %10 : i1 to i32
    %c0_i32_10 = arith.constant 0 : i32
    %12 = arith.cmpi ne, %11, %c0_i32_10 : i32
    scf.if %12 {
      %c0_11 = arith.constant 0 : index
      %c0_12 = arith.constant 0 : index
      %c0_13 = arith.constant 0 : index
      %13 = vector.load %arg16[%c0_11, %c0_12, %c0_13] : memref<8x8x32xf32, #tpu.memory_space<vmem>>, vector<8x8x32xf32>
      %cst_14 = arith.constant dense<0.000000e+00> : vector<8x32xf32>
      %14 = vector.multi_reduction <add>, %13, %cst_14 [1] : vector<8x8x32xf32> to vector<8x32xf32>
      %cst_15 = arith.constant 1.250000e-01 : f32
      %15 = vector.broadcast %cst_15 : f32 to vector<8x32xf32>
      %16 = arith.mulf %14, %15 : vector<8x32xf32>
      %c0_16 = arith.constant 0 : index
      %c0_17 = arith.constant 0 : index
      %17 = vector.load %arg4[%c0_16, %c0_17] : memref<32x16xf32, #tpu.memory_space<vmem>>, vector<32x16xf32>
      %cst_18 = arith.constant dense<0.000000e+00> : vector<8x16xf32>
      %18 = tpu.matmul %16, %17, %cst_18 {dimension_numbers = #tpu.dot_dimension_numbers<[1], [0], [0], [1], [0, 0, 1, 1], [], []>} : vector<8x32xf32>, vector<32x16xf32>, vector<8x16xf32> -> vector<8x16xf32>
      %c0_19 = arith.constant 0 : index
      %c0_20 = arith.constant 0 : index
      %19 = vector.load %arg5[%c0_19, %c0_20] : memref<1x16xf32, #tpu.memory_space<vmem>>, vector<1x16xf32>
      %20 = vector.broadcast %19 : vector<1x16xf32> to vector<8x16xf32>
      %21 = arith.addf %18, %20 : vector<8x16xf32>
      %cst_21 = arith.constant 0.000000e+00 : f32
      %22 = vector.broadcast %cst_21 : f32 to vector<8x16xf32>
      %23 = arith.maximumf %21, %22 : vector<8x16xf32>
      %c0_22 = arith.constant 0 : index
      %c0_23 = arith.constant 0 : index
      %24 = vector.load %arg6[%c0_22, %c0_23] : memref<16x128xf32, #tpu.memory_space<vmem>>, vector<16x128xf32>
      %cst_24 = arith.constant dense<0.000000e+00> : vector<8x128xf32>
      %25 = tpu.matmul %23, %24, %cst_24 {dimension_numbers = #tpu.dot_dimension_numbers<[1], [0], [0], [1], [0, 0, 1, 1], [], []>} : vector<8x16xf32>, vector<16x128xf32>, vector<8x128xf32> -> vector<8x128xf32>
      %c0_25 = arith.constant 0 : index
      %c0_26 = arith.constant 0 : index
      %26 = vector.load %arg7[%c0_25, %c0_26] : memref<1x128xf32, #tpu.memory_space<vmem>>, vector<1x128xf32>
      %27 = vector.broadcast %26 : vector<1x128xf32> to vector<8x128xf32>
      %28 = arith.addf %25, %27 : vector<8x128xf32>
      %c0_27 = arith.constant 0 : index
      %c0_28 = arith.constant 0 : index
      %29 = vector.load %arg8[%c0_27, %c0_28] : memref<128x128xf32, #tpu.memory_space<vmem>>, vector<128x128xf32>
      %cst_29 = arith.constant dense<0.000000e+00> : vector<8x128xf32>
      %30 = tpu.matmul %28, %29, %cst_29 {dimension_numbers = #tpu.dot_dimension_numbers<[1], [0], [0], [1], [0, 0, 1, 1], [], []>} : vector<8x128xf32>, vector<128x128xf32>, vector<8x128xf32> -> vector<8x128xf32>
      %c0_30 = arith.constant 0 : index
      %c0_31 = arith.constant 0 : index
      %31 = vector.load %arg9[%c0_30, %c0_31] : memref<1x128xf32, #tpu.memory_space<vmem>>, vector<1x128xf32>
      %32 = vector.broadcast %31 : vector<1x128xf32> to vector<8x128xf32>
      %33 = arith.addf %30, %32 : vector<8x128xf32>
      %cst_32 = arith.constant 0.000000e+00 : f32
      %34 = vector.broadcast %cst_32 : f32 to vector<8x128xf32>
      %35 = arith.maximumf %33, %34 : vector<8x128xf32>
      %c0_33 = arith.constant 0 : index
      %c0_34 = arith.constant 0 : index
      %36 = vector.load %arg10[%c0_33, %c0_34] : memref<128x128xf32, #tpu.memory_space<vmem>>, vector<128x128xf32>
      %cst_35 = arith.constant dense<0.000000e+00> : vector<8x128xf32>
      %37 = tpu.matmul %35, %36, %cst_35 {dimension_numbers = #tpu.dot_dimension_numbers<[1], [0], [0], [1], [0, 0, 1, 1], [], []>} : vector<8x128xf32>, vector<128x128xf32>, vector<8x128xf32> -> vector<8x128xf32>
      %c0_36 = arith.constant 0 : index
      %c0_37 = arith.constant 0 : index
      %38 = vector.load %arg11[%c0_36, %c0_37] : memref<1x128xf32, #tpu.memory_space<vmem>>, vector<1x128xf32>
      %39 = vector.broadcast %38 : vector<1x128xf32> to vector<8x128xf32>
      %40 = arith.addf %37, %39 : vector<8x128xf32>
      %41 = arith.negf %40 : vector<8x128xf32>
      %42 = math.exp %41 : vector<8x128xf32>
      %cst_38 = arith.constant 1.000000e+00 : f32
      %43 = vector.broadcast %cst_38 : f32 to vector<8x128xf32>
      %44 = arith.addf %43, %42 : vector<8x128xf32>
      %45 = arith.divf %43, %44 : vector<8x128xf32>
      %46 = arith.mulf %45, %28 : vector<8x128xf32>
      %cst_39 = arith.constant 1.000000e+00 : f32
      %47 = vector.broadcast %cst_39 : f32 to vector<8x128xf32>
      %48 = arith.subf %47, %45 : vector<8x128xf32>
      %c0_40 = arith.constant 0 : index
      %c0_41 = arith.constant 0 : index
      %49 = vector.load %arg3[%c0_40, %c0_41] : memref<8x128xf32, #tpu.memory_space<vmem>>, vector<8x128xf32>
      %50 = arith.mulf %48, %49 : vector<8x128xf32>
      %c0_42 = arith.constant 0 : index
      %c0_43 = arith.constant 0 : index
      %51 = vector.load %arg12[%c0_42, %c0_43] : memref<128x128xf32, #tpu.memory_space<vmem>>, vector<128x128xf32>
      %cst_44 = arith.constant dense<0.000000e+00> : vector<8x128xf32>
      %52 = tpu.matmul %46, %51, %cst_44 {dimension_numbers = #tpu.dot_dimension_numbers<[1], [0], [0], [1], [0, 0, 1, 1], [], []>} : vector<8x128xf32>, vector<128x128xf32>, vector<8x128xf32> -> vector<8x128xf32>
      %c0_45 = arith.constant 0 : index
      %c0_46 = arith.constant 0 : index
      %53 = vector.load %arg13[%c0_45, %c0_46] : memref<128x128xf32, #tpu.memory_space<vmem>>, vector<128x128xf32>
      %cst_47 = arith.constant dense<0.000000e+00> : vector<8x128xf32>
      %54 = tpu.matmul %50, %53, %cst_47 {dimension_numbers = #tpu.dot_dimension_numbers<[1], [0], [0], [1], [0, 0, 1, 1], [], []>} : vector<8x128xf32>, vector<128x128xf32>, vector<8x128xf32> -> vector<8x128xf32>
      %55 = arith.addf %52, %54 : vector<8x128xf32>
      %c0_48 = arith.constant 0 : index
      %c0_49 = arith.constant 0 : index
      %56 = vector.load %arg14[%c0_48, %c0_49] : memref<1x128xf32, #tpu.memory_space<vmem>>, vector<1x128xf32>
      %57 = vector.broadcast %56 : vector<1x128xf32> to vector<8x128xf32>
      %58 = arith.addf %55, %57 : vector<8x128xf32>
      %c0_50 = arith.constant 0 : index
      %c0_51 = arith.constant 0 : index
      %59 = vector.load %arg15[%c0_50, %c0_51] : memref<8x128xf32, #tpu.memory_space<vmem>>, vector<8x128xf32>
      tpu.vector_store %arg15[%c0_50, %c0_51], %58 {strides = array<i32>} : memref<8x128xf32, #tpu.memory_space<vmem>>, vector<8x128xf32>,
    } else {
    }
    return
  }
  func.func @transform_0(%arg0: i32, %arg1: i32) -> (i32, i32, i32) {
    %c0_i32 = arith.constant 0 : i32
    %c0_i32_0 = arith.constant 0 : i32
    return %arg0, %arg1, %c0_i32 : i32, i32, i32
  }
  func.func @transform_1(%arg0: i32, %arg1: i32) -> (i32, i32) {
    %c0_i32 = arith.constant 0 : i32
    %c0_i32_0 = arith.constant 0 : i32
    return %arg0, %c0_i32 : i32, i32
  }
  func.func @transform_2(%arg0: i32, %arg1: i32) -> (i32, i32) {
    %c0_i32 = arith.constant 0 : i32
    %c0_i32_0 = arith.constant 0 : i32
    %c0_i32_1 = arith.constant 0 : i32
    return %c0_i32, %c0_i32_0 : i32, i32
  }
  func.func @transform_3(%arg0: i32, %arg1: i32) -> (i32, i32) {
    %c0_i32 = arith.constant 0 : i32
    %c0_i32_0 = arith.constant 0 : i32
    %c0_i32_1 = arith.constant 0 : i32
    return %c0_i32, %c0_i32_0 : i32, i32
  }
  func.func @transform_4(%arg0: i32, %arg1: i32) -> (i32, i32) {
    %c0_i32 = arith.constant 0 : i32
    %c0_i32_0 = arith.constant 0 : i32
    %c0_i32_1 = arith.constant 0 : i32
    return %c0_i32, %c0_i32_0 : i32, i32
  }
  func.func @transform_5(%arg0: i32, %arg1: i32) -> (i32, i32) {
    %c0_i32 = arith.constant 0 : i32
    %c0_i32_0 = arith.constant 0 : i32
    %c0_i32_1 = arith.constant 0 : i32
    return %c0_i32, %c0_i32_0 : i32, i32
  }
  func.func @transform_6(%arg0: i32, %arg1: i32) -> (i32, i32) {
    %c0_i32 = arith.constant 0 : i32
    %c0_i32_0 = arith.constant 0 : i32
    %c0_i32_1 = arith.constant 0 : i32
    return %c0_i32, %c0_i32_0 : i32, i32
  }
  func.func @transform_7(%arg0: i32, %arg1: i32) -> (i32, i32) {
    %c0_i32 = arith.constant 0 : i32
    %c0_i32_0 = arith.constant 0 : i32
    %c0_i32_1 = arith.constant 0 : i32
    return %c0_i32, %c0_i32_0 : i32, i32
  }
  func.func @transform_8(%arg0: i32, %arg1: i32) -> (i32, i32) {
    %c0_i32 = arith.constant 0 : i32
    %c0_i32_0 = arith.constant 0 : i32
    %c0_i32_1 = arith.constant 0 : i32
    return %c0_i32, %c0_i32_0 : i32, i32
  }
  func.func @transform_9(%arg0: i32, %arg1: i32) -> (i32, i32) {
    %c0_i32 = arith.constant 0 : i32
    %c0_i32_0 = arith.constant 0 : i32
    %c0_i32_1 = arith.constant 0 : i32
    return %c0_i32, %c0_i32_0 : i32, i32
  }
  func.func @transform_10(%arg0: i32, %arg1: i32) -> (i32, i32) {
    %c0_i32 = arith.constant 0 : i32
    %c0_i32_0 = arith.constant 0 : i32
    %c0_i32_1 = arith.constant 0 : i32
    return %c0_i32, %c0_i32_0 : i32, i32
  }
  func.func @transform_11(%arg0: i32, %arg1: i32) -> (i32, i32) {
    %c0_i32 = arith.constant 0 : i32
    %c0_i32_0 = arith.constant 0 : i32
    %c0_i32_1 = arith.constant 0 : i32
    return %c0_i32, %c0_i32_0 : i32, i32
  }
  func.func @transform_12(%arg0: i32, %arg1: i32) -> (i32, i32) {
    %c0_i32 = arith.constant 0 : i32
    %c0_i32_0 = arith.constant 0 : i32
    %c0_i32_1 = arith.constant 0 : i32
    return %c0_i32, %c0_i32_0 : i32, i32
  }
  func.func @transform_13(%arg0: i32, %arg1: i32) -> (i32, i32) {
    %c0_i32 = arith.constant 0 : i32
    %c0_i32_0 = arith.constant 0 : i32
    return %arg0, %c0_i32 : i32, i32
  }
}

</mosaic_0001>

<bundles_post_ra>
// kernel: tpu_custom_call.1
= control target key start
LH: loop header
LB: loop body
LE: loop exit
PB: predicated region body
PF: predicated region fallthrough
CT: control target
= control target key end

     0   :  { %18 = vsyncpa [#allocation4], 0  ;;  %s1715_s0 = inlined_call_operand.hbm [shape: bf16[8,16,32], index: 0, kind: input, shape index: {}]   ;;  %s1716_s1 = inlined_call_operand.vmem [shape: f32[8,128], index: 1, kind: input, shape index: {}]   ;;  %s1717_s2 = inlined_call_operand.vmem [shape: f32[32,16], index: 2, kind: input, shape index: {}]   ;;  %s1718_s3 = inlined_call_operand.vmem [shape: f32[1,16], index: 3, kind: input, shape index: {}]   ;;  %s1719_s4 = inlined_call_operand.vmem [shape: f32[16,128], index: 4, kind: input, shape index: {}]   ;;  %s1720_s5 = inlined_call_operand.vmem [shape: f32[1,128], index: 5, kind: input, shape index: {}]   ;;  %s1721_s6 = inlined_call_operand.hbm [shape: f32[128,128], index: 6, kind: input, shape index: {}]   ;;  %s1722_s7 = inlined_call_operand.vmem [shape: f32[1,128], index: 7, kind: input, shape index: {}]   ;;  %s1723_s8 = inlined_call_operand.hbm [shape: f32[128,128], index: 8, kind: input, shape index: {}]   ;;  %s1724_s9 = inlined_call_operand.vmem [shape: f32[1,128], index: 9, kind: input, shape index: {}]   ;;  %s1725_s10 = inlined_call_operand.hbm [shape: f32[128,128], index: 10, kind: input, shape index: {}]   ;;  %s1726_s11 = inlined_call_operand.hbm [shape: f32[128,128], index: 11, kind: input, shape index: {}]   ;;  %s1727_s12 = inlined_call_operand.vmem [shape: f32[1,128], index: 12, kind: input, shape index: {}]   ;;  %s1728_s13 = inlined_call_operand.hbm [shape: f32[8,128], index: 13, kind: output, shape index: {}]  }
   0x1   :  { %19 = vsyncpa [#allocation7], 0 }
   0x2   :  { %20 = vsyncpa [#allocation10], 0 }
   0x3   :  { %21 = vsyncpa [#allocation5], 0  ;;  %s1409_s25 = smov [#allocation6]   ;;  %s1269_s29 = scalar_lea.hbm %s1721_s6, 2048 }
   0x4   :  { %s49_s26 = sshll.u32 %s1409_s25, 4  ;;  %p1270_p0 = scmp.ne.s32.totalorder %s1721_s6, %s1269_s29  ;;  %s50_s26 = int_to_ptr.vmem [resolvable:$true] %s49_s26 }
   0x5   :  { %p1273_p1 = scmp.lt.u32.totalorder %s1269_s29, %s1721_s6 }
   0x7   :  { %p1275_p2 = pnand %p1273_p1, %p1270_p0 }
   0x9   :  { %1278 = shalt.err (!%p1275_p2)
}
   0xa   :  { %s1279_s17 = scalar_lea.vmem %s50_s26, 2048  ;;  %p1284_p4 = scmp.lt.s32.totalorder %s50_s26, %s50_s26 }
   0xb   :  { %p1280_p3 = scmp.ne.s32.totalorder %s50_s26, %s1279_s17  ;;  %p1285_p5 = scmp.lt.s32.totalorder %s1279_s17, %s1279_s17 }
   0xd   :  { %p1286_p6 = por %p1285_p5, %p1284_p4 }
   0xf   :  { %p1287_p7 = pnand %p1286_p6, %p1280_p3 }
  0x11   :  { %1290 = shalt.err (!%p1287_p7)
}
  0x12   :  { %s1410_s18 = smov 128   ;;  %s1411_s19 = smov 8  }
  0x13   :  { %55 = dma.hbm_to_vmem [thread:$0]  %s1721_s6, 2048, %s50_s26, [#allocation7], %s1410_s18, %s1410_s18, %s1411_s19  }
  0x14   :  { %s1412_s22 = smov [#allocation9]   ;;  %s1413_s24 = smov [#allocation3]  }
  0x15   :  { %s77_s23 = sshll.u32 %s1412_s22, 4  ;;  %s27_s25 = sshll.u32 %s1413_s24, 4  ;;  %s78_s23 = int_to_ptr.vmem [resolvable:$true] %s77_s23  ;;  %s28_s25 = int_to_ptr.vmem [resolvable:$true] %s27_s25 }
  0x16   :  { %s1291_s29 = scalar_lea.hbm %s1725_s10, 2048 }
  0x17   :  { %p1292_p8 = scmp.ne.s32.totalorder %s1725_s10, %s1291_s29  ;;  %p1295_p9 = scmp.lt.u32.totalorder %s1291_s29, %s1725_s10 }
  0x19   :  { %p1297_p10 = pnand %p1295_p9, %p1292_p8 }
  0x1b   :  { %1300 = shalt.err (!%p1297_p10)
}
  0x1c   :  { %s1301_s6 = scalar_lea.vmem %s78_s23, 2048  ;;  %p1306_p12 = scmp.lt.s32.totalorder %s78_s23, %s78_s23 }
  0x1d   :  { %p1302_p11 = scmp.ne.s32.totalorder %s78_s23, %s1301_s6  ;;  %p1307_p13 = scmp.lt.s32.totalorder %s1301_s6, %s1301_s6 }
  0x1f   :  { %p1308_p0 = por %p1307_p13, %p1306_p12 }
  0x21   :  { %p1309_p1 = pnand %p1308_p0, %p1302_p11 }
  0x23   :  { %1312 = shalt.err (!%p1309_p1)
}
  0x24   :  { %83 = dma.hbm_to_vmem [thread:$0]  %s1725_s10, 2048, %s78_s23, [#allocation10], %s1410_s18, %s1410_s18, %s1411_s19  }
  0x25   :  { %s1313_s22 = scalar_lea.hbm %s1715_s0, 1024 }
  0x26   :  { %p1314_p2 = scmp.ne.s32.totalorder %s1715_s0, %s1313_s22  ;;  %p1317_p3 = scmp.lt.u32.totalorder %s1313_s22, %s1715_s0 }
  0x28   :  { %p1319_p4 = pnand %p1317_p3, %p1314_p2 }
  0x2a   :  { %1322 = shalt.err (!%p1319_p4)
}
  0x2b   :  { %s1323_s30 = scalar_lea.vmem %s28_s25, 1024  ;;  %p1328_p6 = scmp.lt.s32.totalorder %s28_s25, %s28_s25 }
  0x2c   :  { %p1324_p5 = scmp.ne.s32.totalorder %s28_s25, %s1323_s30  ;;  %p1329_p7 = scmp.lt.s32.totalorder %s1323_s30, %s1323_s30 }
  0x2e   :  { %p1330_p8 = por %p1329_p7, %p1328_p6 }
  0x30   :  { %p1331_p9 = pnand %p1330_p8, %p1324_p5 }
  0x32   :  { %1334 = shalt.err (!%p1331_p9)
}
  0x33   :  { %s1414_s10 = smov 64   ;;  %s1415_s23 = smov 4  }
  0x34   :  { %33 = dma.hbm_to_vmem [thread:$0]  %s1715_s0, 1024, %s28_s25, [#allocation4], %s1414_s10, %s1414_s10, %s1415_s23  }
  0x35   :  { %s1416_s16 = smov [#allocation8]   ;;  %s1417_s26 = smov [#allocation11]  }
  0x36   :  { %s63_s6 = sshll.u32 %s1416_s16, 4  ;;  %s89_s17 = sshll.u32 %s1417_s26, 4  ;;  %s64_s6 = int_to_ptr.vmem [resolvable:$true] %s63_s6  ;;  %s90_s17 = int_to_ptr.vmem [resolvable:$true] %s89_s17 }
  0x37   :  { %s1335_s22 = scalar_lea.hbm %s1723_s8, 2048 }
  0x38   :  { %p1336_p10 = scmp.ne.s32.totalorder %s1723_s8, %s1335_s22  ;;  %p1339_p11 = scmp.lt.u32.totalorder %s1335_s22, %s1723_s8 }
  0x3a   :  { %p1341_p12 = pnand %p1339_p11, %p1336_p10 }
  0x3c   :  { %1344 = shalt.err (!%p1341_p12)
}
  0x3d   :  { %s1345_s0 = scalar_lea.vmem %s64_s6, 2048  ;;  %p1350_p0 = scmp.lt.s32.totalorder %s64_s6, %s64_s6 }
  0x3e   :  { %p1346_p13 = scmp.ne.s32.totalorder %s64_s6, %s1345_s0  ;;  %p1351_p1 = scmp.lt.s32.totalorder %s1345_s0, %s1345_s0 }
  0x40   :  { %p1352_p2 = por %p1351_p1, %p1350_p0 }
  0x42   :  { %p1353_p3 = pnand %p1352_p2, %p1346_p13 }
  0x44   :  { %1356 = shalt.err (!%p1353_p3)
}
  0x45   :  { %69 = dma.hbm_to_vmem [thread:$0]  %s1723_s8, 2048, %s64_s6, [#allocation7], %s1410_s18, %s1410_s18, %s1411_s19  }
  0x46   :  { %s1357_s14 = scalar_lea.hbm %s1726_s11, 2048 }
  0x47   :  { %p1358_p4 = scmp.ne.s32.totalorder %s1726_s11, %s1357_s14  ;;  %p1361_p5 = scmp.lt.u32.totalorder %s1357_s14, %s1726_s11 }
  0x49   :  { %p1363_p6 = pnand %p1361_p5, %p1358_p4 }
  0x4b   :  { %1366 = shalt.err (!%p1363_p6)
}
  0x4c   :  { %s1367_s21 = scalar_lea.vmem %s90_s17, 2048  ;;  %p1372_p8 = scmp.lt.s32.totalorder %s90_s17, %s90_s17 }
  0x4d   :  { %p1368_p7 = scmp.ne.s32.totalorder %s90_s17, %s1367_s21  ;;  %p1373_p9 = scmp.lt.s32.totalorder %s1367_s21, %s1367_s21 }
  0x4f   :  { %p1374_p10 = por %p1373_p9, %p1372_p8 }
  0x51   :  { %p1375_p11 = pnand %p1374_p10, %p1368_p7 }
  0x53   :  { %1378 = shalt.err (!%p1375_p11)
}
  0x54   :  { %95 = dma.hbm_to_vmem [thread:$0]  %s1726_s11, 2048, %s90_s17, [#allocation10], %s1410_s18, %s1410_s18, %s1411_s19  }
  0x55   :  { %1401 = dma.done.wait [#allocation4], 1024  }
  0x56   :  { %1402 = vsyncadd [#allocation4], 4294966272 }
  0x57   :  { %1403 = dma.done.wait [#allocation7], 4096  }
  0x58   :  { %1404 = vsyncadd [#allocation7], 4294963200 }
  0x59   :  { %1405 = dma.done.wait [#allocation10], 4096  }
  0x5a   :  { %1406 = vsyncadd [#allocation10], 4294963200  ;;  %vm117_vm0 = vcmask 261120   ;;  %v1418_v0 = vmov 0.0|0.0   ;;  %vm1419_vm1 = vmmov 0   ;;  %v1420_v1 = vmov 0.0  }
  0x5b   :  { %1147 = vmatprep.subr.bf16.mxu0 %v1418_v0  ;;  %997 = vmatprep.mubr.msk.f32.mxu0 %vm1419_vm1, %v1420_v1  ;;  %118 = vst.msk [vmem:[#allocation2] sm:$0xff] %vm117_vm0, %v1420_v1  ;;  %119 = vst.msk [vmem:[#allocation2 + $0x8] sm:$0xff] %vm117_vm0, %v1420_v1  ;;  %v282_v2 = vld [vmem:[%s1717_s2] sm:$0xff]  ;;  %v283_v3 = vld [vmem:[%s1717_s2 + $0x8] sm:$0xff]  ;;  %vm301_vm2 = vcmask 1041409   ;;  %vm303_vm3 = vcmask 1042434  }
  0x5c   :  { %120 = vst.msk [vmem:[#allocation2 + $0x10] sm:$0xff] %vm117_vm0, %v1420_v1  ;;  %121 = vst.msk [vmem:[#allocation2 + $0x18] sm:$0xff] %vm117_vm0, %v1420_v1  ;;  %1153 = vmatprep.subr.bf16.mxu1 %v1418_v0  ;;  %1004 = vmatprep.mubr.msk.f32.mxu1 %vm1419_vm1, %v1420_v1  ;;  %v284_v4 = vld [vmem:[%s1717_s2 + $0x10] sm:$0xff]  ;;  %v1148_v5 = vpack.c.bf16 %v283_v3, %v282_v2  ;;  %v285_v6 = vld [vmem:[%s1717_s2 + $0x18] sm:$0xff]  ;;  %vm305_vm4 = vcmask 1043459   ;;  %vm307_vm5 = vcmask 1044484  }
  0x5d   :  { %122 = vst.msk [vmem:[#allocation2 + $0x20] sm:$0xff] %vm117_vm0, %v1420_v1  ;;  %123 = vst.msk [vmem:[#allocation2 + $0x28] sm:$0xff] %vm117_vm0, %v1420_v1  ;;  %v875_v7 = vld [vmem:[#allocation3] sm:$0xff]   ;;  %v906_v8 = vld [vmem:[#allocation3 + $0x8] sm:$0xff]   ;;  %v1151_v9 = vpack.c.bf16 %v285_v6, %v284_v4  ;;  %vm309_vm6 = vcmask 1045509   ;;  %vm311_vm7 = vcmask 1046534  }
  0x5e   :  { %124 = vst.msk [vmem:[#allocation2 + $0x30] sm:$0xff] %vm117_vm0, %v1420_v1  ;;  %125 = vst.msk [vmem:[#allocation2 + $0x38] sm:$0xff] %vm117_vm0, %v1420_v1  ;;  %v876_v10 = vunpack.c.l.bf16 %v875_v7  ;;  %v877_v11 = vunpack.c.h.bf16 %v875_v7  ;;  %v880_v12 = vunpack.c.l.bf16 %v906_v8  ;;  %v907_v13 = vld [vmem:[#allocation3 + $0x10] sm:$0xff]   ;;  %v908_v14 = vld [vmem:[#allocation3 + $0x18] sm:$0xff]   ;;  %1149 = vmatpush3.bf16.msra.mxu0 %v1148_v5  ;;  %v881_v16 = vunpack.c.h.bf16 %v906_v8  ;;  %s1421_s20 = smov [#allocation12]  }
  0x5f   :  { %v909_v15 = vld [vmem:[#allocation3 + $0x20] sm:$0xff]   ;;  %v884_v17 = vunpack.c.l.bf16 %v907_v13  ;;  %v885_v18 = vunpack.c.h.bf16 %v907_v13  ;;  %v888_v19 = vunpack.c.l.bf16 %v908_v14  ;;  %v910_v20 = vld [vmem:[#allocation3 + $0x28] sm:$0xff]   ;;  %v911_v21 = vld [vmem:[#allocation3 + $0x30] sm:$0xff]   ;;  %1150 = vmatprep.subr.bf16.mxu0 %v1418_v0  ;;  %v889_v23 = vunpack.c.h.bf16 %v908_v14  ;;  %s855_s21 = sshll.u32 %s1421_s20, 4  ;;  %s856_s21 = int_to_ptr.vmem [resolvable:$true] %s855_s21 }
  0x60   :  { %v912_v22 = vld [vmem:[#allocation3 + $0x38] sm:$0xff]   ;;  %v892_v24 = vunpack.c.l.bf16 %v909_v15  ;;  %v893_v25 = vunpack.c.h.bf16 %v909_v15  ;;  %v896_v26 = vunpack.c.l.bf16 %v910_v20  ;;  %v897_v27 = vunpack.c.h.bf16 %v910_v20  ;;  %p1384_p13 = scmp.lt.s32.totalorder %s856_s21, %s856_s21 }
  0x61   :  { %v900_v28 = vunpack.c.l.bf16 %v911_v21  ;;  %v901_v29 = vunpack.c.h.bf16 %v911_v21  ;;  %v904_v30 = vunpack.c.l.bf16 %v912_v22  ;;  %v905_v31 = vunpack.c.h.bf16 %v912_v22 }
  0x62   :  { %v167_v32 = vsel %vm117_vm0, %v876_v10, 0.0  ;;  %v168_v33 = vsel %vm117_vm0, %v877_v11, 0.0  ;;  %v170_v34 = vsel %vm117_vm0, %v880_v12, 0.0  ;;  %1152 = vmatpush3.bf16.msra.mxu0 %v1151_v9  ;;  %v171_v36 = vsel %vm117_vm0, %v881_v16, 0.0  ;;  %v158_v39 = vld [vmem:[#allocation2] sm:$0xff]  ;;  %v159_v44 = vld [vmem:[#allocation2 + $0x8] sm:$0xff] }
  0x63   :  { %v169_v35 = vadd.f32 %v168_v33, %v167_v32  ;;  %v173_v37 = vsel %vm117_vm0, %v884_v17, 0.0  ;;  %v174_v38 = vsel %vm117_vm0, %v885_v18, 0.0  ;;  %v172_v40 = vadd.f32 %v171_v36, %v170_v34  ;;  %1180 = vmatprep.subr.bf16.mxu0 %v1418_v0  ;;  %v160_v45 = vld [vmem:[#allocation2 + $0x10] sm:$0xff]  ;;  %v161_v46 = vld [vmem:[#allocation2 + $0x18] sm:$0xff] }
  0x64   :  { %v175_v41 = vadd.f32 %v174_v38, %v173_v37  ;;  %v176_v42 = vsel %vm117_vm0, %v888_v19, 0.0  ;;  %v177_v43 = vsel %vm117_vm0, %v889_v23, 0.0  ;;  %v179_v48 = vsel %vm117_vm0, %v892_v24, 0.0  ;;  %v162_v51 = vld [vmem:[#allocation2 + $0x20] sm:$0xff]  ;;  %v163_v52 = vld [vmem:[#allocation2 + $0x28] sm:$0xff] }
  0x65   :  { %v178_v47 = vadd.f32 %v177_v43, %v176_v42  ;;  %v180_v49 = vsel %vm117_vm0, %v893_v25, 0.0  ;;  %v182_v50 = vsel %vm117_vm0, %v896_v26, 0.0  ;;  %v164_v53 = vld [vmem:[#allocation2 + $0x30] sm:$0xff]  ;;  %v183_v55 = vsel %vm117_vm0, %v897_v27, 0.0  ;;  %v165_v58 = vld [vmem:[#allocation2 + $0x38] sm:$0xff] }
  0x66   :  { %v181_v54 = vadd.f32 %v180_v49, %v179_v48  ;;  %v185_v56 = vsel %vm117_vm0, %v900_v28, 0.0  ;;  %v186_v57 = vsel %vm117_vm0, %v901_v29, 0.0  ;;  %v184_v59 = vadd.f32 %v183_v55, %v182_v50 }
  0x67   :  { %v187_v60 = vadd.f32 %v186_v57, %v185_v56  ;;  %v188_v61 = vsel %vm117_vm0, %v904_v30, 0.0  ;;  %v189_v62 = vsel %vm117_vm0, %v905_v31, 0.0  ;;  %v191_v2 = vadd.f32 %v169_v35, %v158_v39 }
  0x68   :  { %v190_v63 = vadd.f32 %v189_v62, %v188_v61  ;;  %v192_v3 = vadd.f32 %v172_v40, %v159_v44  ;;  %v193_v4 = vadd.f32 %v175_v41, %v160_v45  ;;  %v194_v5 = vadd.f32 %v178_v47, %v161_v46 }
  0x69   :  { %v195_v6 = vadd.f32 %v181_v54, %v162_v51  ;;  %v196_v7 = vadd.f32 %v184_v59, %v163_v52  ;;  %v197_v8 = vadd.f32 %v187_v60, %v164_v53  ;;  %199 = vst.msk [vmem:[#allocation2] sm:$0xff] %vm117_vm0, %v191_v2  ;;  %vm313_vm8 = vcmask 1047559  }
  0x6a   :  { %v198_v9 = vadd.f32 %v190_v63, %v165_v58  ;;  %200 = vst.msk [vmem:[#allocation2 + $0x8] sm:$0xff] %vm117_vm0, %v192_v3  ;;  %201 = vst.msk [vmem:[#allocation2 + $0x10] sm:$0xff] %vm117_vm0, %v193_v4  ;;  %vm397_vm9 = vcmask 130048  }
  0x6b   :  { %202 = vst.msk [vmem:[#allocation2 + $0x18] sm:$0xff] %vm117_vm0, %v194_v5  ;;  %203 = vst.msk [vmem:[#allocation2 + $0x20] sm:$0xff] %vm117_vm0, %v195_v6 }
  0x6c   :  { %204 = vst.msk [vmem:[#allocation2 + $0x28] sm:$0xff] %vm117_vm0, %v196_v7  ;;  %205 = vst.msk [vmem:[#allocation2 + $0x30] sm:$0xff] %vm117_vm0, %v197_v8 }
  0x6d   :  { %206 = vst.msk [vmem:[#allocation2 + $0x38] sm:$0xff] %vm117_vm0, %v198_v9 }
  0x70   :  { %v210_v10 = vld [vmem:[#allocation2] sm:$0xff] }
  0x71   :  { %v211_v11 = vld [vmem:[#allocation2 + $0x8] sm:$0xff]  ;;  %v212_v12 = vld [vmem:[#allocation2 + $0x10] sm:$0xff]  ;;  %v218_v16 = vsel %vm117_vm0, %v210_v10, 0.0 }
  0x72   :  { %v213_v13 = vld [vmem:[#allocation2 + $0x18] sm:$0xff]  ;;  %v214_v14 = vld [vmem:[#allocation2 + $0x20] sm:$0xff]  ;;  %v225_v17 = vsel %vm117_vm0, %v211_v11, 0.0  ;;  %v232_v18 = vsel %vm117_vm0, %v212_v12, 0.0  ;;  %v219_v21 = vrot.slane %v218_v16, 4 }
  0x73   :  { %v215_v15 = vld [vmem:[#allocation2 + $0x28] sm:$0xff]  ;;  %v216_v19 = vld [vmem:[#allocation2 + $0x30] sm:$0xff]  ;;  %v226_v22 = vrot.slane %v225_v17, 4  ;;  %v233_v23 = vrot.slane %v232_v18, 4  ;;  %v239_v24 = vsel %vm117_vm0, %v213_v13, 0.0  ;;  %v246_v26 = vsel %vm117_vm0, %v214_v14, 0.0 }
  0x74   :  { %v217_v20 = vld [vmem:[#allocation2 + $0x38] sm:$0xff]  ;;  %v240_v25 = vrot.slane %v239_v24, 4  ;;  %v253_v27 = vsel %vm117_vm0, %v215_v15, 0.0  ;;  %v260_v28 = vsel %vm117_vm0, %v216_v19, 0.0  ;;  %v220_v29 = vadd.f32 %v219_v21, %v218_v16 }
  0x75   :  { %v227_v30 = vadd.f32 %v226_v22, %v225_v17  ;;  %v234_v31 = vadd.f32 %v233_v23, %v232_v18  ;;  %v247_v32 = vrot.slane %v246_v26, 4  ;;  %v254_v34 = vrot.slane %v253_v27, 4 }
  0x76   :  { %v241_v33 = vadd.f32 %v240_v25, %v239_v24  ;;  %v261_v35 = vrot.slane %v260_v28, 4  ;;  %v267_v36 = vsel %vm117_vm0, %v217_v20, 0.0  ;;  %v221_v37 = vrot.slane %v220_v29, 2 }
  0x77   :  { %v228_v38 = vrot.slane %v227_v30, 2  ;;  %v235_v39 = vrot.slane %v234_v31, 2  ;;  %v248_v40 = vadd.f32 %v247_v32, %v246_v26  ;;  %v255_v42 = vadd.f32 %v254_v34, %v253_v27  ;;  %v388_v27 = vld [vmem:[%s1719_s4] sm:$0xff]  ;;  %v472_v32 = vld [vmem:[#allocation6 + $0x8] sm:$0xff] }
  0x78   :  { %v242_v41 = vrot.slane %v241_v33, 2  ;;  %v262_v43 = vadd.f32 %v261_v35, %v260_v28  ;;  %v268_v44 = vrot.slane %v267_v36, 4  ;;  %v222_v45 = vadd.f32 %v221_v37, %v220_v29  ;;  %v389_v28 = vld [vmem:[%s1719_s4 + $0x8] sm:$0xff] }
  0x79   :  { %v229_v46 = vadd.f32 %v228_v38, %v227_v30  ;;  %v236_v47 = vadd.f32 %v235_v39, %v234_v31  ;;  %v249_v48 = vrot.slane %v248_v40, 2  ;;  %v256_v50 = vrot.slane %v255_v42, 2  ;;  %v866_v30 = vld [vmem:[%s1718_s3] ss:$0 sm:$0xff]  ;;  %v473_v38 = vld [vmem:[#allocation6 + $0x10] sm:$0xff]  ;;  %v474_v39 = vld [vmem:[#allocation6 + $0x18] sm:$0xff] }
  0x7a   :  { %v243_v49 = vadd.f32 %v242_v41, %v241_v33  ;;  %v263_v51 = vrot.slane %v262_v43, 2  ;;  %v269_v52 = vadd.f32 %v268_v44, %v267_v36  ;;  %v223_v53 = vrot.slane %v222_v45, 1  ;;  %v471_v31 = vld [vmem:[#allocation6] sm:$0xff]  ;;  %v477_v44 = vld [vmem:[#allocation6 + $0x30] sm:$0xff] }
  0x7b   :  { %v230_v54 = vrot.slane %v229_v46, 1  ;;  %v237_v55 = vrot.slane %v236_v47, 1  ;;  %v250_v56 = vadd.f32 %v249_v48, %v248_v40  ;;  %v257_v58 = vadd.f32 %v256_v50, %v255_v42  ;;  %v475_v41 = vld [vmem:[#allocation6 + $0x20] sm:$0xff]  ;;  %v476_v42 = vld [vmem:[#allocation6 + $0x28] sm:$0xff]  ;;  %v481_v50 = vld [vmem:[#allocation6 + $0x50] sm:$0xff] }
  0x7c   :  { %v244_v57 = vrot.slane %v243_v49, 1  ;;  %v264_v59 = vadd.f32 %v263_v51, %v262_v43  ;;  %v270_v60 = vrot.slane %v269_v52, 2  ;;  %v224_v61 = vadd.f32 %v223_v53, %v222_v45  ;;  %v478_v45 = vld [vmem:[#allocation6 + $0x38] sm:$0xff]  ;;  %v480_v48 = vld [vmem:[#allocation6 + $0x48] sm:$0xff]  ;;  %v483_v53 = vld [vmem:[#allocation6 + $0x60] sm:$0xff] }
  0x7d   :  { %v231_v62 = vadd.f32 %v230_v54, %v229_v46  ;;  %v238_v63 = vadd.f32 %v237_v55, %v236_v47  ;;  %v251_v2 = vrot.slane %v250_v56, 1  ;;  %v258_v4 = vrot.slane %v257_v58, 1  ;;  %v479_v47 = vld [vmem:[#allocation6 + $0x40] sm:$0xff]  ;;  %v482_v51 = vld [vmem:[#allocation6 + $0x58] sm:$0xff]  ;;  %v484_v54 = vld [vmem:[#allocation6 + $0x68] sm:$0xff] }
  0x7e   :  { %v245_v3 = vadd.f32 %v244_v57, %v243_v49  ;;  %v265_v5 = vrot.slane %v264_v59, 1  ;;  %v271_v6 = vadd.f32 %v270_v60, %v269_v52  ;;  %v274_v8 = vmul.f32 0.125, %v224_v61  ;;  %v486_v57 = vld [vmem:[#allocation6 + $0x78] sm:$0xff]  ;;  %v566_v60 = vld [vmem:[#allocation8 + $0x8] sm:$0xff]  ;;  %v567_v61 = vld [vmem:[#allocation8 + $0x10] sm:$0xff] }
  0x7f   :  { %v252_v7 = vadd.f32 %v251_v2, %v250_v56  ;;  %v275_v9 = vmul.f32 0.125, %v231_v62  ;;  %v276_v10 = vmul.f32 0.125, %v238_v63  ;;  %v259_v11 = vadd.f32 %v258_v4, %v257_v58  ;;  %v485_v56 = vld [vmem:[#allocation6 + $0x70] sm:$0xff]  ;;  %v568_v63 = vld [vmem:[#allocation8 + $0x18] sm:$0xff]  ;;  %v570_v4 = vld [vmem:[#allocation8 + $0x28] sm:$0xff] }
  0x80   :  { %v266_v12 = vadd.f32 %v265_v5, %v264_v59  ;;  %v272_v13 = vrot.slane %v271_v6, 1  ;;  %v277_v14 = vmul.f32 0.125, %v245_v3  ;;  %v1154_v29 = vpack.c.bf16 %v389_v28, %v388_v27  ;;  %v565_v59 = vld [vmem:[#allocation8] sm:$0xff] }
  0x81   :  { %v278_v15 = vmul.f32 0.125, %v252_v7  ;;  %v302_v16 = vsel %vm301_vm2, %v275_v9, %v274_v8  ;;  %v279_v18 = vmul.f32 0.125, %v259_v11  ;;  %v1157_v36 = vpack.c.bf16 %v472_v32, %v471_v31  ;;  %v569_v3 = vld [vmem:[#allocation8 + $0x20] sm:$0xff]  ;;  %v572_v7 = vld [vmem:[#allocation8 + $0x38] sm:$0xff]  ;;  %v669_v31 = vld [vmem:[#allocation9 + $0x8] sm:$0xff] }
  0x82   :  { %v273_v17 = vadd.f32 %v272_v13, %v271_v6  ;;  %v280_v19 = vmul.f32 0.125, %v266_v12  ;;  %v304_v20 = vsel %vm303_vm3, %v276_v10, %v302_v16  ;;  %1155 = vmatpush3.bf16.msra.mxu1 %v1154_v29  ;;  %v1160_v40 = vpack.c.bf16 %v474_v39, %v473_v38  ;;  %v571_v6 = vld [vmem:[#allocation8 + $0x30] sm:$0xff]  ;;  %v573_v9 = vld [vmem:[#allocation8 + $0x40] sm:$0xff]  ;;  %v574_v10 = vld [vmem:[#allocation8 + $0x48] sm:$0xff] }
  0x83   :  { %v306_v21 = vsel %vm305_vm4, %v277_v14, %v304_v20  ;;  %1156 = vmatprep.subr.bf16.mxu1 %v1418_v0  ;;  %v1163_v43 = vpack.c.bf16 %v476_v42, %v475_v41  ;;  %v1166_v46 = vpack.c.bf16 %v478_v45, %v477_v44  ;;  %v1169_v49 = vpack.c.bf16 %v480_v48, %v479_v47  ;;  %v575_v12 = vld [vmem:[#allocation8 + $0x50] sm:$0xff]  ;;  %v576_v13 = vld [vmem:[#allocation8 + $0x58] sm:$0xff]  ;;  %v578_v16 = vld [vmem:[#allocation8 + $0x68] sm:$0xff] }
  0x84   :  { %v281_v22 = vmul.f32 0.125, %v273_v17  ;;  %v308_v23 = vsel %vm307_vm5, %v278_v15, %v306_v21  ;;  %v1172_v52 = vpack.c.bf16 %v482_v51, %v481_v50  ;;  %v1175_v55 = vpack.c.bf16 %v484_v54, %v483_v53  ;;  %v577_v15 = vld [vmem:[#allocation8 + $0x60] sm:$0xff]  ;;  %v686_v39 = vld [vmem:[#allocation11 + $0x10] sm:$0xff]  ;;  %v673_v42 = vld [vmem:[#allocation9 + $0x28] sm:$0xff] }
  0x85   :  { %v310_v24 = vsel %vm309_vm6, %v279_v18, %v308_v23  ;;  %v1178_v58 = vpack.c.bf16 %v486_v57, %v485_v56  ;;  %v1181_v62 = vpack.c.bf16 %v566_v60, %v565_v59  ;;  %v1184_v2 = vpack.c.bf16 %v568_v63, %v567_v61  ;;  %v868_v18 = vld [vmem:[%s1720_s5] ss:$0 sm:$0xff]  ;;  %v580_v23 = vld [vmem:[#allocation8 + $0x78] sm:$0xff]  ;;  %v689_v45 = vld [vmem:[#allocation11 + $0x28] sm:$0xff] }
  0x86   :  { %v312_v25 = vsel %vm311_vm7, %v280_v19, %v310_v24  ;;  %v1187_v5 = vpack.c.bf16 %v570_v4, %v569_v3  ;;  %v1190_v8 = vpack.c.bf16 %v572_v7, %v571_v6  ;;  %v1193_v11 = vpack.c.bf16 %v574_v10, %v573_v9  ;;  %v688_v44 = vld [vmem:[#allocation11 + $0x20] sm:$0xff]  ;;  %v674_v47 = vld [vmem:[#allocation9 + $0x30] sm:$0xff]  ;;  %v675_v48 = vld [vmem:[#allocation9 + $0x38] sm:$0xff] }
  0x87   :  { %v314_v26 = vsel %vm313_vm8, %v281_v22, %v312_v25  ;;  %v1196_v14 = vpack.c.bf16 %v576_v13, %v575_v12  ;;  %v1199_v17 = vpack.c.bf16 %v578_v16, %v577_v15  ;;  %v579_v22 = vld [vmem:[#allocation8 + $0x70] sm:$0xff]  ;;  %v870_v25 = vld [vmem:[%s1722_s7] ss:$0 sm:$0xff]  ;;  %v691_v51 = vld [vmem:[#allocation11 + $0x38] sm:$0xff] }
  0x88   :  { %998 = vmatmul.mubr.msk.f32.vlgmr.msra.gmra.mrb[0].mxu0 %vm117_vm0, %v314_v26  ;;  %v1202_v24 = vpack.c.bf16 %v580_v23, %v579_v22  ;;  %v690_v50 = vld [vmem:[#allocation11 + $0x30] sm:$0xff]  ;;  %v676_v53 = vld [vmem:[#allocation9 + $0x40] sm:$0xff]  ;;  %v677_v54 = vld [vmem:[#allocation9 + $0x48] sm:$0xff] }
  0x89   :  { %1074 = vmatprep.mubr.msk.f32.mxu0 %vm1419_vm1, %v1420_v1  ;;  %1182 = vmatpush3.bf16.msra.mxu0 %v1181_v62  ;;  %v692_v56 = vld [vmem:[#allocation11 + $0x40] sm:$0xff]  ;;  %v693_v57 = vld [vmem:[#allocation11 + $0x48] sm:$0xff]  ;;  %v678_v59 = vld [vmem:[#allocation9 + $0x50] sm:$0xff] }
  0x8a   :  { %1183 = vmatprep.subr.bf16.mxu0 %v1418_v0  ;;  %v679_v60 = vld [vmem:[#allocation9 + $0x58] sm:$0xff]  ;;  %v694_v62 = vld [vmem:[#allocation11 + $0x50] sm:$0xff]  ;;  %v681_v4 = vld [vmem:[#allocation9 + $0x68] sm:$0xff] }
  0x8b   :  { %v1244_v61 = vpack.c.bf16 %v679_v60, %v678_v59  ;;  %v695_v63 = vld [vmem:[#allocation11 + $0x58] sm:$0xff]  ;;  %v697_v6 = vld [vmem:[#allocation11 + $0x68] sm:$0xff]  ;;  %v871_v15 = vld [vmem:[%s1724_s9] ss:$0 sm:$0xff] }
  0x8c   :  { %v1220_v3 = vpack.c.bf16 %v695_v63, %v694_v62  ;;  %v683_v9 = vld [vmem:[#allocation9 + $0x78] sm:$0xff] }
  0x8d   :  { %1185 = vmatpush3.bf16.msra.mxu0 %v1184_v2  ;;  %v680_v2 = vld [vmem:[#allocation9 + $0x60] sm:$0xff]  ;;  %v699_v12 = vld [vmem:[#allocation11 + $0x78] sm:$0xff] }
  0x8e   :  { %1186 = vmatprep.subr.bf16.mxu0 %v1418_v0  ;;  %v1247_v7 = vpack.c.bf16 %v681_v4, %v680_v2 }
  0x91   :  { %1188 = vmatpush3.bf16.msra.mxu0 %v1187_v5  ;;  %v696_v5 = vld [vmem:[#allocation11 + $0x60] sm:$0xff] }
  0x92   :  { %1189 = vmatprep.subr.bf16.mxu0 %v1418_v0  ;;  %v1223_v10 = vpack.c.bf16 %v697_v6, %v696_v5 }
  0x95   :  { %1191 = vmatpush3.bf16.msra.mxu0 %v1190_v8  ;;  %v682_v8 = vld [vmem:[#allocation9 + $0x70] sm:$0xff] }
  0x96   :  { %1192 = vmatprep.subr.bf16.mxu0 %v1418_v0  ;;  %v1250_v13 = vpack.c.bf16 %v683_v9, %v682_v8 }
  0x99   :  { %1194 = vmatpush3.bf16.msra.mxu0 %v1193_v11  ;;  %v698_v11 = vld [vmem:[#allocation11 + $0x70] sm:$0xff] }
  0x9a   :  { %1195 = vmatprep.subr.bf16.mxu0 %v1418_v0 }
  0x9d   :  { %1197 = vmatpush3.bf16.msra.mxu0 %v1196_v14  ;;  %v1226_v14 = vpack.c.bf16 %v699_v12, %v698_v11 }
  0x9e   :  { %1198 = vmatprep.subr.bf16.mxu0 %v1418_v0 }
  0xa1   :  { %1200 = vmatpush3.bf16.msra.mxu0 %v1199_v17 }
  0xa2   :  { %1201 = vmatprep.subr.bf16.mxu0 %v1418_v0 }
  0xa5   :  { %1203 = vmatpush3.bf16.msra.mxu0 %v1202_v24  ;;  %v666_v24 = vld [vmem:[%s1716_s1] sm:$0xff]  ;;  %s1379_s1 = scalar_lea.vmem %s856_s21, 128 }
  0xa6   :  { %1228 = vmatprep.subr.bf16.mxu0 %v1418_v0  ;;  %p1380_p12 = scmp.ne.s32.totalorder %s856_s21, %s1379_s1  ;;  %p1385_p0 = scmp.lt.s32.totalorder %s1379_s1, %s1379_s1 }
  0xa8   :  { %p1386_p1 = por %p1385_p0, %p1384_p13 }
  0xaa   :  { %p1387_p2 = pnand %p1386_p1, %p1380_p12 }
 0x15b   :  { %v383_v33 = vpop.f32.mrb[0].mxu0 }
 0x15c   :  { %v384_v34 = vadd.f32 %v866_v30, %v383_v33  ;;  %v999_v35 = vpop.f32.mrb[1].mxu0  ;;  %v668_v30 = vld [vmem:[#allocation9] sm:$0xff] }
 0x15d   :  { %v1229_v32 = vpack.c.bf16 %v669_v31, %v668_v30  ;;  %v684_v33 = vld [vmem:[#allocation11] sm:$0xff] }
 0x15e   :  { %v387_v37 = vmax.f32 %v384_v34, 0.0  ;;  %v685_v34 = vld [vmem:[#allocation11 + $0x8] sm:$0xff]  ;;  %v873_v30 = vld [vmem:[%s1727_s12] ss:$0 sm:$0xff] }
 0x15f   :  { %v1205_v35 = vpack.c.bf16 %v685_v34, %v684_v33 }
 0x160   :  { %1005 = vmatmul.mubr.msk.f32.vlgmr.msra.gmra.mrb[0].mxu1 %vm397_vm9, %v387_v37  ;;  %v671_v37 = vld [vmem:[#allocation9 + $0x18] sm:$0xff] }
 0x161   :  { %1158 = vmatpush3.bf16.msra.mxu1 %v1157_v36  ;;  %1039 = vmatprep.mubr.msk.f32.mxu1 %vm1419_vm1, %v1420_v1  ;;  %v670_v36 = vld [vmem:[#allocation9 + $0x10] sm:$0xff] }
 0x162   :  { %1159 = vmatprep.subr.bf16.mxu1 %v1418_v0  ;;  %v1232_v38 = vpack.c.bf16 %v671_v37, %v670_v36 }
 0x165   :  { %1161 = vmatpush3.bf16.msra.mxu1 %v1160_v40  ;;  %v687_v40 = vld [vmem:[#allocation11 + $0x18] sm:$0xff] }
 0x166   :  { %1162 = vmatprep.subr.bf16.mxu1 %v1418_v0  ;;  %v1208_v41 = vpack.c.bf16 %v687_v40, %v686_v39 }
 0x169   :  { %1164 = vmatpush3.bf16.msra.mxu1 %v1163_v43 }
 0x16a   :  { %1165 = vmatprep.subr.bf16.mxu1 %v1418_v0 }
 0x16d   :  { %1167 = vmatpush3.bf16.msra.mxu1 %v1166_v46  ;;  %v1211_v46 = vpack.c.bf16 %v689_v45, %v688_v44 }
 0x16e   :  { %1168 = vmatprep.subr.bf16.mxu1 %v1418_v0 }
 0x171   :  { %1170 = vmatpush3.bf16.msra.mxu1 %v1169_v49  ;;  %v1238_v49 = vpack.c.bf16 %v675_v48, %v674_v47 }
 0x172   :  { %1171 = vmatprep.subr.bf16.mxu1 %v1418_v0 }
 0x175   :  { %1173 = vmatpush3.bf16.msra.mxu1 %v1172_v52  ;;  %v1214_v52 = vpack.c.bf16 %v691_v51, %v690_v50 }
 0x176   :  { %1174 = vmatprep.subr.bf16.mxu1 %v1418_v0 }
 0x179   :  { %1176 = vmatpush3.bf16.msra.mxu1 %v1175_v55  ;;  %v1241_v55 = vpack.c.bf16 %v677_v54, %v676_v53 }
 0x17a   :  { %1177 = vmatprep.subr.bf16.mxu1 %v1418_v0 }
 0x17d   :  { %1179 = vmatpush3.bf16.msra.mxu1 %v1178_v58  ;;  %v1217_v58 = vpack.c.bf16 %v693_v57, %v692_v56 }
 0x17e   :  { %1204 = vmatprep.subr.bf16.mxu1 %v1418_v0 }
 0x233   :  { %v467_v19 = vpop.f32.mrb[0].mxu1 }
 0x234   :  { %v1668_v20 = vadd.f32 %v868_v18, %v467_v19  ;;  %v1006_v21 = vpop.f32.mrb[1].mxu1 }
 0x236   :  { %1040 = vmatmul.mubr.f32.vlgmr.msra.gmra.mrb[2].mxu1 %v1668_v20 }
 0x237   :  { %1109 = vmatprep.mubr.msk.f32.mxu1 %vm1419_vm1, %v1420_v1  ;;  %1206 = vmatpush3.bf16.msra.mxu1 %v1205_v35 }
 0x238   :  { %1207 = vmatprep.subr.bf16.mxu1 %v1418_v0 }
 0x23b   :  { %1209 = vmatpush3.bf16.msra.mxu1 %v1208_v41 }
 0x23c   :  { %1210 = vmatprep.subr.bf16.mxu1 %v1418_v0 }
 0x23f   :  { %1212 = vmatpush3.bf16.msra.mxu1 %v1211_v46 }
 0x240   :  { %1213 = vmatprep.subr.bf16.mxu1 %v1418_v0 }
 0x243   :  { %1215 = vmatpush3.bf16.msra.mxu1 %v1214_v52 }
 0x244   :  { %1216 = vmatprep.subr.bf16.mxu1 %v1418_v0 }
 0x247   :  { %1218 = vmatpush3.bf16.msra.mxu1 %v1217_v58 }
 0x248   :  { %1219 = vmatprep.subr.bf16.mxu1 %v1418_v0 }
 0x24b   :  { %1221 = vmatpush3.bf16.msra.mxu1 %v1220_v3 }
 0x24c   :  { %1222 = vmatprep.subr.bf16.mxu1 %v1418_v0 }
 0x24f   :  { %1224 = vmatpush3.bf16.msra.mxu1 %v1223_v10 }
 0x250   :  { %1225 = vmatprep.subr.bf16.mxu1 %v1418_v0 }
 0x253   :  { %1227 = vmatpush3.bf16.msra.mxu1 %v1226_v14 }
 0x309   :  { %v560_v26 = vpop.f32.mrb[2].mxu1 }
 0x30a   :  { %v561_v27 = vadd.f32 %v870_v25, %v560_v26  ;;  %v1041_v28 = vpop.f32.mrb[3].mxu1 }
 0x30c   :  { %v564_v29 = vmax.f32 %v561_v27, 0.0 }
 0x30e   :  { %1075 = vmatmul.mubr.f32.vlgmr.msra.gmra.mrb[2].mxu0 %v564_v29 }
 0x30f   :  { %1144 = vmatprep.mubr.msk.f32.mxu0 %vm1419_vm1, %v1420_v1  ;;  %1230 = vmatpush3.bf16.msra.mxu0 %v1229_v32  ;;  %v672_v1 = vld [vmem:[#allocation9 + $0x20] sm:$0xff] }
 0x310   :  { %1231 = vmatprep.subr.bf16.mxu0 %v1418_v0  ;;  %v1235_v43 = vpack.c.bf16 %v673_v42, %v672_v1 }
 0x313   :  { %1233 = vmatpush3.bf16.msra.mxu0 %v1232_v38 }
 0x314   :  { %1234 = vmatprep.subr.bf16.mxu0 %v1418_v0 }
 0x317   :  { %1236 = vmatpush3.bf16.msra.mxu0 %v1235_v43 }
 0x318   :  { %1237 = vmatprep.subr.bf16.mxu0 %v1418_v0 }
 0x31b   :  { %1239 = vmatpush3.bf16.msra.mxu0 %v1238_v49 }
 0x31c   :  { %1240 = vmatprep.subr.bf16.mxu0 %v1418_v0 }
 0x31f   :  { %1242 = vmatpush3.bf16.msra.mxu0 %v1241_v55 }
 0x320   :  { %1243 = vmatprep.subr.bf16.mxu0 %v1418_v0 }
 0x323   :  { %1245 = vmatpush3.bf16.msra.mxu0 %v1244_v61 }
 0x324   :  { %1246 = vmatprep.subr.bf16.mxu0 %v1418_v0 }
 0x327   :  { %1248 = vmatpush3.bf16.msra.mxu0 %v1247_v7 }
 0x328   :  { %1249 = vmatprep.subr.bf16.mxu0 %v1418_v0 }
 0x32b   :  { %1251 = vmatpush3.bf16.msra.mxu0 %v1250_v13 }
 0x3e1   :  { %v654_v16 = vpop.f32.mrb[2].mxu0 }
 0x3e2   :  { %v655_v17 = vadd.f32 %v871_v15, %v654_v16  ;;  %v1076_v18 = vpop.f32.mrb[3].mxu0 }
 0x3e4   :  { %v872_v19 = vmul.f32 -1.442695, %v655_v17 }
 0x3e6   :  { %1265 = vpow2.f32 %v872_v19 }
 0x3f0   :  { %v1266_v21 = vpop.eup %1265 }
 0x3f1   :  { %v661_v22 = vadd.f32 1.0, %v1266_v21 }
 0x3f3   :  { %1267 = vrcp.f32 %v661_v22 }
 0x3fd   :  { %v1268_v23 = vpop.eup %1267 }
 0x3fe   :  { %v664_v0 = vmul.f32 %v1268_v23, %v1668_v20  ;;  %v665_v25 = vsub.f32 1.0, %v1268_v23 }
 0x400   :  { %1145 = vmatmul.mubr.f32.vlgmr.msra.gmra.mrb[4].mxu0 %v664_v0  ;;  %v667_v26 = vmul.f32 %v666_v24, %v665_v25 }
 0x402   :  { %1110 = vmatmul.mubr.f32.vlgmr.msra.gmra.mrb[4].mxu1 %v667_v26 }
 0x4d3   :  { %v836_v27 = vpop.f32.mrb[4].mxu0 }
 0x4d4   :  { %v1146_v28 = vpop.f32.mrb[5].mxu0 }
 0x4d5   :  { %v766_v29 = vpop.f32.mrb[4].mxu1 }
 0x4d6   :  { %v837_v31 = vadd.f32 %v836_v27, %v766_v29  ;;  %v1111_v32 = vpop.f32.mrb[5].mxu1 }
 0x4d8   :  { %v847_v33 = vadd.f32 %v873_v30, %v837_v31 }
 0x4da   :  { %848 = vst [vmem:[#allocation12] sm:$0xff] %v847_v33 }
 0x4db   :  { %1390 = shalt.err (!%p1387_p2)
}
 0x4dc   :  { %s1391_s11 = scalar_lea.hbm %s1728_s13, 128 }
 0x4dd   :  { %p1392_p3 = scmp.ne.s32.totalorder %s1728_s13, %s1391_s11  ;;  %p1395_p4 = scmp.lt.u32.totalorder %s1391_s11, %s1728_s13 }
 0x4df   :  { %p1397_p5 = pnand %p1395_p4, %p1392_p3 }
 0x4e1   :  { %1400 = shalt.err (!%p1397_p5)
}
 0x4e2   :  { %858 = dma.vmem_to_hbm [thread:$0]  %s856_s21, 128, %s1728_s13, [#allocation5]  }
 0x4e3   :  { %1407 = dma.done.wait [#allocation5], 128  }
 0x4e4   :  { %1408 = vsyncadd [#allocation5], 4294967168 }
 0x4e5   :  { %862 = vsyncpa [#allocation4], 1 }
 0x4e6   :  { %863 = vsyncpa [#allocation7], 1 }
 0x4e7   :  { %864 = vsyncpa [#allocation10], 1 }
 0x4e8   :  { %865 = vsyncpa [#allocation5], 1 }

// kernel: tpu_custom_call.1
= control target key start
LH: loop header
LB: loop body
LE: loop exit
PB: predicated region body
PF: predicated region fallthrough
CT: control target
= control target key end

     0   :  { %18 = vsyncpa [#allocation4], 0  ;;  %s1715_s0 = inlined_call_operand.hbm [shape: bf16[8,16,32], index: 0, kind: input, shape index: {}]   ;;  %s1716_s1 = inlined_call_operand.vmem [shape: f32[8,128], index: 1, kind: input, shape index: {}]   ;;  %s1717_s2 = inlined_call_operand.vmem [shape: f32[32,16], index: 2, kind: input, shape index: {}]   ;;  %s1718_s3 = inlined_call_operand.vmem [shape: f32[1,16], index: 3, kind: input, shape index: {}]   ;;  %s1719_s4 = inlined_call_operand.vmem [shape: f32[16,128], index: 4, kind: input, shape index: {}]   ;;  %s1720_s5 = inlined_call_operand.vmem [shape: f32[1,128], index: 5, kind: input, shape index: {}]   ;;  %s1721_s6 = inlined_call_operand.hbm [shape: f32[128,128], index: 6, kind: input, shape index: {}]   ;;  %s1722_s7 = inlined_call_operand.vmem [shape: f32[1,128], index: 7, kind: input, shape index: {}]   ;;  %s1723_s8 = inlined_call_operand.hbm [shape: f32[128,128], index: 8, kind: input, shape index: {}]   ;;  %s1724_s9 = inlined_call_operand.vmem [shape: f32[1,128], index: 9, kind: input, shape index: {}]   ;;  %s1725_s10 = inlined_call_operand.hbm [shape: f32[128,128], index: 10, kind: input, shape index: {}]   ;;  %s1726_s11 = inlined_call_operand.hbm [shape: f32[128,128], index: 11, kind: input, shape index: {}]   ;;  %s1727_s12 = inlined_call_operand.vmem [shape: f32[1,128], index: 12, kind: input, shape index: {}]   ;;  %s1728_s13 = inlined_call_operand.hbm [shape: f32[8,128], index: 13, kind: output, shape index: {}]  }
   0x1   :  { %19 = vsyncpa [#allocation7], 0 }
   0x2   :  { %20 = vsyncpa [#allocation10], 0 }
   0x3   :  { %21 = vsyncpa [#allocation5], 0  ;;  %s1409_s25 = smov [#allocation6]   ;;  %s1269_s29 = scalar_lea.hbm %s1721_s6, 2048 }
   0x4   :  { %s49_s26 = sshll.u32 %s1409_s25, 4  ;;  %p1270_p0 = scmp.ne.s32.totalorder %s1721_s6, %s1269_s29  ;;  %s50_s26 = int_to_ptr.vmem [resolvable:$true] %s49_s26 }
   0x5   :  { %p1273_p1 = scmp.lt.u32.totalorder %s1269_s29, %s1721_s6 }
   0x7   :  { %p1275_p2 = pnand %p1273_p1, %p1270_p0 }
   0x9   :  { %1278 = shalt.err (!%p1275_p2)
}
   0xa   :  { %s1279_s17 = scalar_lea.vmem %s50_s26, 2048  ;;  %p1284_p4 = scmp.lt.s32.totalorder %s50_s26, %s50_s26 }
   0xb   :  { %p1280_p3 = scmp.ne.s32.totalorder %s50_s26, %s1279_s17  ;;  %p1285_p5 = scmp.lt.s32.totalorder %s1279_s17, %s1279_s17 }
   0xd   :  { %p1286_p6 = por %p1285_p5, %p1284_p4 }
   0xf   :  { %p1287_p7 = pnand %p1286_p6, %p1280_p3 }
  0x11   :  { %1290 = shalt.err (!%p1287_p7)
}
  0x12   :  { %s1410_s18 = smov 128   ;;  %s1411_s19 = smov 8  }
  0x13   :  { %55 = dma.hbm_to_vmem [thread:$0]  %s1721_s6, 2048, %s50_s26, [#allocation7], %s1410_s18, %s1410_s18, %s1411_s19  }
  0x14   :  { %s1412_s22 = smov [#allocation9]   ;;  %s1413_s24 = smov [#allocation3]  }
  0x15   :  { %s77_s23 = sshll.u32 %s1412_s22, 4  ;;  %s27_s25 = sshll.u32 %s1413_s24, 4  ;;  %s78_s23 = int_to_ptr.vmem [resolvable:$true] %s77_s23  ;;  %s28_s25 = int_to_ptr.vmem [resolvable:$true] %s27_s25 }
  0x16   :  { %s1291_s29 = scalar_lea.hbm %s1725_s10, 2048 }
  0x17   :  { %p1292_p8 = scmp.ne.s32.totalorder %s1725_s10, %s1291_s29  ;;  %p1295_p9 = scmp.lt.u32.totalorder %s1291_s29, %s1725_s10 }
  0x19   :  { %p1297_p10 = pnand %p1295_p9, %p1292_p8 }
  0x1b   :  { %1300 = shalt.err (!%p1297_p10)
}
  0x1c   :  { %s1301_s6 = scalar_lea.vmem %s78_s23, 2048  ;;  %p1306_p12 = scmp.lt.s32.totalorder %s78_s23, %s78_s23 }
  0x1d   :  { %p1302_p11 = scmp.ne.s32.totalorder %s78_s23, %s1301_s6  ;;  %p1307_p13 = scmp.lt.s32.totalorder %s1301_s6, %s1301_s6 }
  0x1f   :  { %p1308_p0 = por %p1307_p13, %p1306_p12 }
  0x21   :  { %p1309_p1 = pnand %p1308_p0, %p1302_p11 }
  0x23   :  { %1312 = shalt.err (!%p1309_p1)
}
  0x24   :  { %83 = dma.hbm_to_vmem [thread:$0]  %s1725_s10, 2048, %s78_s23, [#allocation10], %s1410_s18, %s1410_s18, %s1411_s19  }
  0x25   :  { %s1313_s22 = scalar_lea.hbm %s1715_s0, 1024 }
  0x26   :  { %p1314_p2 = scmp.ne.s32.totalorder %s1715_s0, %s1313_s22  ;;  %p1317_p3 = scmp.lt.u32.totalorder %s1313_s22, %s1715_s0 }
  0x28   :  { %p1319_p4 = pnand %p1317_p3, %p1314_p2 }
  0x2a   :  { %1322 = shalt.err (!%p1319_p4)
}
  0x2b   :  { %s1323_s30 = scalar_lea.vmem %s28_s25, 1024  ;;  %p1328_p6 = scmp.lt.s32.totalorder %s28_s25, %s28_s25 }
  0x2c   :  { %p1324_p5 = scmp.ne.s32.totalorder %s28_s25, %s1323_s30  ;;  %p1329_p7 = scmp.lt.s32.totalorder %s1323_s30, %s1323_s30 }
  0x2e   :  { %p1330_p8 = por %p1329_p7, %p1328_p6 }
  0x30   :  { %p1331_p9 = pnand %p1330_p8, %p1324_p5 }
  0x32   :  { %1334 = shalt.err (!%p1331_p9)
}
  0x33   :  { %s1414_s10 = smov 64   ;;  %s1415_s23 = smov 4  }
  0x34   :  { %33 = dma.hbm_to_vmem [thread:$0]  %s1715_s0, 1024, %s28_s25, [#allocation4], %s1414_s10, %s1414_s10, %s1415_s23  }
  0x35   :  { %s1416_s16 = smov [#allocation8]   ;;  %s1417_s26 = smov [#allocation11]  }
  0x36   :  { %s63_s6 = sshll.u32 %s1416_s16, 4  ;;  %s89_s17 = sshll.u32 %s1417_s26, 4  ;;  %s64_s6 = int_to_ptr.vmem [resolvable:$true] %s63_s6  ;;  %s90_s17 = int_to_ptr.vmem [resolvable:$true] %s89_s17 }
  0x37   :  { %s1335_s22 = scalar_lea.hbm %s1723_s8, 2048 }
  0x38   :  { %p1336_p10 = scmp.ne.s32.totalorder %s1723_s8, %s1335_s22  ;;  %p1339_p11 = scmp.lt.u32.totalorder %s1335_s22, %s1723_s8 }
  0x3a   :  { %p1341_p12 = pnand %p1339_p11, %p1336_p10 }
  0x3c   :  { %1344 = shalt.err (!%p1341_p12)
}
  0x3d   :  { %s1345_s0 = scalar_lea.vmem %s64_s6, 2048  ;;  %p1350_p0 = scmp.lt.s32.totalorder %s64_s6, %s64_s6 }
  0x3e   :  { %p1346_p13 = scmp.ne.s32.totalorder %s64_s6, %s1345_s0  ;;  %p1351_p1 = scmp.lt.s32.totalorder %s1345_s0, %s1345_s0 }
  0x40   :  { %p1352_p2 = por %p1351_p1, %p1350_p0 }
  0x42   :  { %p1353_p3 = pnand %p1352_p2, %p1346_p13 }
  0x44   :  { %1356 = shalt.err (!%p1353_p3)
}
  0x45   :  { %69 = dma.hbm_to_vmem [thread:$0]  %s1723_s8, 2048, %s64_s6, [#allocation7], %s1410_s18, %s1410_s18, %s1411_s19  }
  0x46   :  { %s1357_s14 = scalar_lea.hbm %s1726_s11, 2048 }
  0x47   :  { %p1358_p4 = scmp.ne.s32.totalorder %s1726_s11, %s1357_s14  ;;  %p1361_p5 = scmp.lt.u32.totalorder %s1357_s14, %s1726_s11 }
  0x49   :  { %p1363_p6 = pnand %p1361_p5, %p1358_p4 }
  0x4b   :  { %1366 = shalt.err (!%p1363_p6)
}
  0x4c   :  { %s1367_s21 = scalar_lea.vmem %s90_s17, 2048  ;;  %p1372_p8 = scmp.lt.s32.totalorder %s90_s17, %s90_s17 }
  0x4d   :  { %p1368_p7 = scmp.ne.s32.totalorder %s90_s17, %s1367_s21  ;;  %p1373_p9 = scmp.lt.s32.totalorder %s1367_s21, %s1367_s21 }
  0x4f   :  { %p1374_p10 = por %p1373_p9, %p1372_p8 }
  0x51   :  { %p1375_p11 = pnand %p1374_p10, %p1368_p7 }
  0x53   :  { %1378 = shalt.err (!%p1375_p11)
}
  0x54   :  { %95 = dma.hbm_to_vmem [thread:$0]  %s1726_s11, 2048, %s90_s17, [#allocation10], %s1410_s18, %s1410_s18, %s1411_s19  }
  0x55   :  { %1401 = dma.done.wait [#allocation4], 1024  }
  0x56   :  { %1402 = vsyncadd [#allocation4], 4294966272 }
  0x57   :  { %1403 = dma.done.wait [#allocation7], 4096  }
  0x58   :  { %1404 = vsyncadd [#allocation7], 4294963200 }
  0x59   :  { %1405 = dma.done.wait [#allocation10], 4096  }
  0x5a   :  { %1406 = vsyncadd [#allocation10], 4294963200  ;;  %vm117_vm0 = vcmask 261120   ;;  %v1418_v0 = vmov 0.0|0.0   ;;  %vm1419_vm1 = vmmov 0   ;;  %v1420_v1 = vmov 0.0  }
  0x5b   :  { %1147 = vmatprep.subr.bf16.mxu0 %v1418_v0  ;;  %997 = vmatprep.mubr.msk.f32.mxu0 %vm1419_vm1, %v1420_v1  ;;  %118 = vst.msk [vmem:[#allocation2] sm:$0xff] %vm117_vm0, %v1420_v1  ;;  %119 = vst.msk [vmem:[#allocation2 + $0x8] sm:$0xff] %vm117_vm0, %v1420_v1  ;;  %v282_v2 = vld [vmem:[%s1717_s2] sm:$0xff]  ;;  %v283_v3 = vld [vmem:[%s1717_s2 + $0x8] sm:$0xff]  ;;  %vm301_vm2 = vcmask 1041409   ;;  %vm303_vm3 = vcmask 1042434  }
  0x5c   :  { %120 = vst.msk [vmem:[#allocation2 + $0x10] sm:$0xff] %vm117_vm0, %v1420_v1  ;;  %121 = vst.msk [vmem:[#allocation2 + $0x18] sm:$0xff] %vm117_vm0, %v1420_v1  ;;  %1153 = vmatprep.subr.bf16.mxu1 %v1418_v0  ;;  %1004 = vmatprep.mubr.msk.f32.mxu1 %vm1419_vm1, %v1420_v1  ;;  %v284_v4 = vld [vmem:[%s1717_s2 + $0x10] sm:$0xff]  ;;  %v1148_v5 = vpack.c.bf16 %v283_v3, %v282_v2  ;;  %v285_v6 = vld [vmem:[%s1717_s2 + $0x18] sm:$0xff]  ;;  %vm305_vm4 = vcmask 1043459   ;;  %vm307_vm5 = vcmask 1044484  }
  0x5d   :  { %122 = vst.msk [vmem:[#allocation2 + $0x20] sm:$0xff] %vm117_vm0, %v1420_v1  ;;  %123 = vst.msk [vmem:[#allocation2 + $0x28] sm:$0xff] %vm117_vm0, %v1420_v1  ;;  %v875_v7 = vld [vmem:[#allocation3] sm:$0xff]   ;;  %v906_v8 = vld [vmem:[#allocation3 + $0x8] sm:$0xff]   ;;  %v1151_v9 = vpack.c.bf16 %v285_v6, %v284_v4  ;;  %vm309_vm6 = vcmask 1045509   ;;  %vm311_vm7 = vcmask 1046534  }
  0x5e   :  { %124 = vst.msk [vmem:[#allocation2 + $0x30] sm:$0xff] %vm117_vm0, %v1420_v1  ;;  %125 = vst.msk [vmem:[#allocation2 + $0x38] sm:$0xff] %vm117_vm0, %v1420_v1  ;;  %v876_v10 = vunpack.c.l.bf16 %v875_v7  ;;  %v877_v11 = vunpack.c.h.bf16 %v875_v7  ;;  %v880_v12 = vunpack.c.l.bf16 %v906_v8  ;;  %v907_v13 = vld [vmem:[#allocation3 + $0x10] sm:$0xff]   ;;  %v908_v14 = vld [vmem:[#allocation3 + $0x18] sm:$0xff]   ;;  %1149 = vmatpush3.bf16.msra.mxu0 %v1148_v5  ;;  %v881_v16 = vunpack.c.h.bf16 %v906_v8  ;;  %s1421_s20 = smov [#allocation12]  }
  0x5f   :  { %v909_v15 = vld [vmem:[#allocation3 + $0x20] sm:$0xff]   ;;  %v884_v17 = vunpack.c.l.bf16 %v907_v13  ;;  %v885_v18 = vunpack.c.h.bf16 %v907_v13  ;;  %v888_v19 = vunpack.c.l.bf16 %v908_v14  ;;  %v910_v20 = vld [vmem:[#allocation3 + $0x28] sm:$0xff]   ;;  %v911_v21 = vld [vmem:[#allocation3 + $0x30] sm:$0xff]   ;;  %1150 = vmatprep.subr.bf16.mxu0 %v1418_v0  ;;  %v889_v23 = vunpack.c.h.bf16 %v908_v14  ;;  %s855_s21 = sshll.u32 %s1421_s20, 4  ;;  %s856_s21 = int_to_ptr.vmem [resolvable:$true] %s855_s21 }
  0x60   :  { %v912_v22 = vld [vmem:[#allocation3 + $0x38] sm:$0xff]   ;;  %v892_v24 = vunpack.c.l.bf16 %v909_v15  ;;  %v893_v25 = vunpack.c.h.bf16 %v909_v15  ;;  %v896_v26 = vunpack.c.l.bf16 %v910_v20  ;;  %v897_v27 = vunpack.c.h.bf16 %v910_v20  ;;  %p1384_p13 = scmp.lt.s32.totalorder %s856_s21, %s856_s21 }
  0x61   :  { %v900_v28 = vunpack.c.l.bf16 %v911_v21  ;;  %v901_v29 = vunpack.c.h.bf16 %v911_v21  ;;  %v904_v30 = vunpack.c.l.bf16 %v912_v22  ;;  %v905_v31 = vunpack.c.h.bf16 %v912_v22 }
  0x62   :  { %v167_v32 = vsel %vm117_vm0, %v876_v10, 0.0  ;;  %v168_v33 = vsel %vm117_vm0, %v877_v11, 0.0  ;;  %v170_v34 = vsel %vm117_vm0, %v880_v12, 0.0  ;;  %1152 = vmatpush3.bf16.msra.mxu0 %v1151_v9  ;;  %v171_v36 = vsel %vm117_vm0, %v881_v16, 0.0  ;;  %v158_v39 = vld [vmem:[#allocation2] sm:$0xff]  ;;  %v159_v44 = vld [vmem:[#allocation2 + $0x8] sm:$0xff] }
  0x63   :  { %v169_v35 = vadd.f32 %v168_v33, %v167_v32  ;;  %v173_v37 = vsel %vm117_vm0, %v884_v17, 0.0  ;;  %v174_v38 = vsel %vm117_vm0, %v885_v18, 0.0  ;;  %v172_v40 = vadd.f32 %v171_v36, %v170_v34  ;;  %1180 = vmatprep.subr.bf16.mxu0 %v1418_v0  ;;  %v160_v45 = vld [vmem:[#allocation2 + $0x10] sm:$0xff]  ;;  %v161_v46 = vld [vmem:[#allocation2 + $0x18] sm:$0xff] }
  0x64   :  { %v175_v41 = vadd.f32 %v174_v38, %v173_v37  ;;  %v176_v42 = vsel %vm117_vm0, %v888_v19, 0.0  ;;  %v177_v43 = vsel %vm117_vm0, %v889_v23, 0.0  ;;  %v179_v48 = vsel %vm117_vm0, %v892_v24, 0.0  ;;  %v162_v51 = vld [vmem:[#allocation2 + $0x20] sm:$0xff]  ;;  %v163_v52 = vld [vmem:[#allocation2 + $0x28] sm:$0xff] }
  0x65   :  { %v178_v47 = vadd.f32 %v177_v43, %v176_v42  ;;  %v180_v49 = vsel %vm117_vm0, %v893_v25, 0.0  ;;  %v182_v50 = vsel %vm117_vm0, %v896_v26, 0.0  ;;  %v164_v53 = vld [vmem:[#allocation2 + $0x30] sm:$0xff]  ;;  %v183_v55 = vsel %vm117_vm0, %v897_v27, 0.0  ;;  %v165_v58 = vld [vmem:[#allocation2 + $0x38] sm:$0xff] }
  0x66   :  { %v181_v54 = vadd.f32 %v180_v49, %v179_v48  ;;  %v185_v56 = vsel %vm117_vm0, %v900_v28, 0.0  ;;  %v186_v57 = vsel %vm117_vm0, %v901_v29, 0.0  ;;  %v184_v59 = vadd.f32 %v183_v55, %v182_v50 }
  0x67   :  { %v187_v60 = vadd.f32 %v186_v57, %v185_v56  ;;  %v188_v61 = vsel %vm117_vm0, %v904_v30, 0.0  ;;  %v189_v62 = vsel %vm117_vm0, %v905_v31, 0.0  ;;  %v191_v2 = vadd.f32 %v169_v35, %v158_v39 }
  0x68   :  { %v190_v63 = vadd.f32 %v189_v62, %v188_v61  ;;  %v192_v3 = vadd.f32 %v172_v40, %v159_v44  ;;  %v193_v4 = vadd.f32 %v175_v41, %v160_v45  ;;  %v194_v5 = vadd.f32 %v178_v47, %v161_v46 }
  0x69   :  { %v195_v6 = vadd.f32 %v181_v54, %v162_v51  ;;  %v196_v7 = vadd.f32 %v184_v59, %v163_v52  ;;  %v197_v8 = vadd.f32 %v187_v60, %v164_v53  ;;  %199 = vst.msk [vmem:[#allocation2] sm:$0xff] %vm117_vm0, %v191_v2  ;;  %vm313_vm8 = vcmask 1047559  }
  0x6a   :  { %v198_v9 = vadd.f32 %v190_v63, %v165_v58  ;;  %200 = vst.msk [vmem:[#allocation2 + $0x8] sm:$0xff] %vm117_vm0, %v192_v3  ;;  %201 = vst.msk [vmem:[#allocation2 + $0x10] sm:$0xff] %vm117_vm0, %v193_v4  ;;  %vm397_vm9 = vcmask 130048  }
  0x6b   :  { %202 = vst.msk [vmem:[#allocation2 + $0x18] sm:$0xff] %vm117_vm0, %v194_v5  ;;  %203 = vst.msk [vmem:[#allocation2 + $0x20] sm:$0xff] %vm117_vm0, %v195_v6 }
  0x6c   :  { %204 = vst.msk [vmem:[#allocation2 + $0x28] sm:$0xff] %vm117_vm0, %v196_v7  ;;  %205 = vst.msk [vmem:[#allocation2 + $0x30] sm:$0xff] %vm117_vm0, %v197_v8 }
  0x6d   :  { %206 = vst.msk [vmem:[#allocation2 + $0x38] sm:$0xff] %vm117_vm0, %v198_v9 }
  0x70   :  { %v210_v10 = vld [vmem:[#allocation2] sm:$0xff] }
  0x71   :  { %v211_v11 = vld [vmem:[#allocation2 + $0x8] sm:$0xff]  ;;  %v212_v12 = vld [vmem:[#allocation2 + $0x10] sm:$0xff]  ;;  %v218_v16 = vsel %vm117_vm0, %v210_v10, 0.0 }
  0x72   :  { %v213_v13 = vld [vmem:[#allocation2 + $0x18] sm:$0xff]  ;;  %v214_v14 = vld [vmem:[#allocation2 + $0x20] sm:$0xff]  ;;  %v225_v17 = vsel %vm117_vm0, %v211_v11, 0.0  ;;  %v232_v18 = vsel %vm117_vm0, %v212_v12, 0.0  ;;  %v219_v21 = vrot.slane %v218_v16, 4 }
  0x73   :  { %v215_v15 = vld [vmem:[#allocation2 + $0x28] sm:$0xff]  ;;  %v216_v19 = vld [vmem:[#allocation2 + $0x30] sm:$0xff]  ;;  %v226_v22 = vrot.slane %v225_v17, 4  ;;  %v233_v23 = vrot.slane %v232_v18, 4  ;;  %v239_v24 = vsel %vm117_vm0, %v213_v13, 0.0  ;;  %v246_v26 = vsel %vm117_vm0, %v214_v14, 0.0 }
  0x74   :  { %v217_v20 = vld [vmem:[#allocation2 + $0x38] sm:$0xff]  ;;  %v240_v25 = vrot.slane %v239_v24, 4  ;;  %v253_v27 = vsel %vm117_vm0, %v215_v15, 0.0  ;;  %v260_v28 = vsel %vm117_vm0, %v216_v19, 0.0  ;;  %v220_v29 = vadd.f32 %v219_v21, %v218_v16 }
  0x75   :  { %v227_v30 = vadd.f32 %v226_v22, %v225_v17  ;;  %v234_v31 = vadd.f32 %v233_v23, %v232_v18  ;;  %v247_v32 = vrot.slane %v246_v26, 4  ;;  %v254_v34 = vrot.slane %v253_v27, 4 }
  0x76   :  { %v241_v33 = vadd.f32 %v240_v25, %v239_v24  ;;  %v261_v35 = vrot.slane %v260_v28, 4  ;;  %v267_v36 = vsel %vm117_vm0, %v217_v20, 0.0  ;;  %v221_v37 = vrot.slane %v220_v29, 2 }
  0x77   :  { %v228_v38 = vrot.slane %v227_v30, 2  ;;  %v235_v39 = vrot.slane %v234_v31, 2  ;;  %v248_v40 = vadd.f32 %v247_v32, %v246_v26  ;;  %v255_v42 = vadd.f32 %v254_v34, %v253_v27  ;;  %v388_v27 = vld [vmem:[%s1719_s4] sm:$0xff]  ;;  %v472_v32 = vld [vmem:[#allocation6 + $0x8] sm:$0xff] }
  0x78   :  { %v242_v41 = vrot.slane %v241_v33, 2  ;;  %v262_v43 = vadd.f32 %v261_v35, %v260_v28  ;;  %v268_v44 = vrot.slane %v267_v36, 4  ;;  %v222_v45 = vadd.f32 %v221_v37, %v220_v29  ;;  %v389_v28 = vld [vmem:[%s1719_s4 + $0x8] sm:$0xff] }
  0x79   :  { %v229_v46 = vadd.f32 %v228_v38, %v227_v30  ;;  %v236_v47 = vadd.f32 %v235_v39, %v234_v31  ;;  %v249_v48 = vrot.slane %v248_v40, 2  ;;  %v256_v50 = vrot.slane %v255_v42, 2  ;;  %v866_v30 = vld [vmem:[%s1718_s3] ss:$0 sm:$0xff]  ;;  %v473_v38 = vld [vmem:[#allocation6 + $0x10] sm:$0xff]  ;;  %v474_v39 = vld [vmem:[#allocation6 + $0x18] sm:$0xff] }
  0x7a   :  { %v243_v49 = vadd.f32 %v242_v41, %v241_v33  ;;  %v263_v51 = vrot.slane %v262_v43, 2  ;;  %v269_v52 = vadd.f32 %v268_v44, %v267_v36  ;;  %v223_v53 = vrot.slane %v222_v45, 1  ;;  %v471_v31 = vld [vmem:[#allocation6] sm:$0xff]  ;;  %v477_v44 = vld [vmem:[#allocation6 + $0x30] sm:$0xff] }
  0x7b   :  { %v230_v54 = vrot.slane %v229_v46, 1  ;;  %v237_v55 = vrot.slane %v236_v47, 1  ;;  %v250_v56 = vadd.f32 %v249_v48, %v248_v40  ;;  %v257_v58 = vadd.f32 %v256_v50, %v255_v42  ;;  %v475_v41 = vld [vmem:[#allocation6 + $0x20] sm:$0xff]  ;;  %v476_v42 = vld [vmem:[#allocation6 + $0x28] sm:$0xff]  ;;  %v481_v50 = vld [vmem:[#allocation6 + $0x50] sm:$0xff] }
  0x7c   :  { %v244_v57 = vrot.slane %v243_v49, 1  ;;  %v264_v59 = vadd.f32 %v263_v51, %v262_v43  ;;  %v270_v60 = vrot.slane %v269_v52, 2  ;;  %v224_v61 = vadd.f32 %v223_v53, %v222_v45  ;;  %v478_v45 = vld [vmem:[#allocation6 + $0x38] sm:$0xff]  ;;  %v480_v48 = vld [vmem:[#allocation6 + $0x48] sm:$0xff]  ;;  %v483_v53 = vld [vmem:[#allocation6 + $0x60] sm:$0xff] }
  0x7d   :  { %v231_v62 = vadd.f32 %v230_v54, %v229_v46  ;;  %v238_v63 = vadd.f32 %v237_v55, %v236_v47  ;;  %v251_v2 = vrot.slane %v250_v56, 1  ;;  %v258_v4 = vrot.slane %v257_v58, 1  ;;  %v479_v47 = vld [vmem:[#allocation6 + $0x40] sm:$0xff]  ;;  %v482_v51 = vld [vmem:[#allocation6 + $0x58] sm:$0xff]  ;;  %v484_v54 = vld [vmem:[#allocation6 + $0x68] sm:$0xff] }
  0x7e   :  { %v245_v3 = vadd.f32 %v244_v57, %v243_v49  ;;  %v265_v5 = vrot.slane %v264_v59, 1  ;;  %v271_v6 = vadd.f32 %v270_v60, %v269_v52  ;;  %v274_v8 = vmul.f32 0.125, %v224_v61  ;;  %v486_v57 = vld [vmem:[#allocation6 + $0x78] sm:$0xff]  ;;  %v566_v60 = vld [vmem:[#allocation8 + $0x8] sm:$0xff]  ;;  %v567_v61 = vld [vmem:[#allocation8 + $0x10] sm:$0xff] }
  0x7f   :  { %v252_v7 = vadd.f32 %v251_v2, %v250_v56  ;;  %v275_v9 = vmul.f32 0.125, %v231_v62  ;;  %v276_v10 = vmul.f32 0.125, %v238_v63  ;;  %v259_v11 = vadd.f32 %v258_v4, %v257_v58  ;;  %v485_v56 = vld [vmem:[#allocation6 + $0x70] sm:$0xff]  ;;  %v568_v63 = vld [vmem:[#allocation8 + $0x18] sm:$0xff]  ;;  %v570_v4 = vld [vmem:[#allocation8 + $0x28] sm:$0xff] }
  0x80   :  { %v266_v12 = vadd.f32 %v265_v5, %v264_v59  ;;  %v272_v13 = vrot.slane %v271_v6, 1  ;;  %v277_v14 = vmul.f32 0.125, %v245_v3  ;;  %v1154_v29 = vpack.c.bf16 %v389_v28, %v388_v27  ;;  %v565_v59 = vld [vmem:[#allocation8] sm:$0xff] }
  0x81   :  { %v278_v15 = vmul.f32 0.125, %v252_v7  ;;  %v302_v16 = vsel %vm301_vm2, %v275_v9, %v274_v8  ;;  %v279_v18 = vmul.f32 0.125, %v259_v11  ;;  %v1157_v36 = vpack.c.bf16 %v472_v32, %v471_v31  ;;  %v569_v3 = vld [vmem:[#allocation8 + $0x20] sm:$0xff]  ;;  %v572_v7 = vld [vmem:[#allocation8 + $0x38] sm:$0xff]  ;;  %v669_v31 = vld [vmem:[#allocation9 + $0x8] sm:$0xff] }
  0x82   :  { %v273_v17 = vadd.f32 %v272_v13, %v271_v6  ;;  %v280_v19 = vmul.f32 0.125, %v266_v12  ;;  %v304_v20 = vsel %vm303_vm3, %v276_v10, %v302_v16  ;;  %1155 = vmatpush3.bf16.msra.mxu1 %v1154_v29  ;;  %v1160_v40 = vpack.c.bf16 %v474_v39, %v473_v38  ;;  %v571_v6 = vld [vmem:[#allocation8 + $0x30] sm:$0xff]  ;;  %v573_v9 = vld [vmem:[#allocation8 + $0x40] sm:$0xff]  ;;  %v574_v10 = vld [vmem:[#allocation8 + $0x48] sm:$0xff] }
  0x83   :  { %v306_v21 = vsel %vm305_vm4, %v277_v14, %v304_v20  ;;  %1156 = vmatprep.subr.bf16.mxu1 %v1418_v0  ;;  %v1163_v43 = vpack.c.bf16 %v476_v42, %v475_v41  ;;  %v1166_v46 = vpack.c.bf16 %v478_v45, %v477_v44  ;;  %v1169_v49 = vpack.c.bf16 %v480_v48, %v479_v47  ;;  %v575_v12 = vld [vmem:[#allocation8 + $0x50] sm:$0xff]  ;;  %v576_v13 = vld [vmem:[#allocation8 + $0x58] sm:$0xff]  ;;  %v578_v16 = vld [vmem:[#allocation8 + $0x68] sm:$0xff] }
  0x84   :  { %v281_v22 = vmul.f32 0.125, %v273_v17  ;;  %v308_v23 = vsel %vm307_vm5, %v278_v15, %v306_v21  ;;  %v1172_v52 = vpack.c.bf16 %v482_v51, %v481_v50  ;;  %v1175_v55 = vpack.c.bf16 %v484_v54, %v483_v53  ;;  %v577_v15 = vld [vmem:[#allocation8 + $0x60] sm:$0xff]  ;;  %v686_v39 = vld [vmem:[#allocation11 + $0x10] sm:$0xff]  ;;  %v673_v42 = vld [vmem:[#allocation9 + $0x28] sm:$0xff] }
  0x85   :  { %v310_v24 = vsel %vm309_vm6, %v279_v18, %v308_v23  ;;  %v1178_v58 = vpack.c.bf16 %v486_v57, %v485_v56  ;;  %v1181_v62 = vpack.c.bf16 %v566_v60, %v565_v59  ;;  %v1184_v2 = vpack.c.bf16 %v568_v63, %v567_v61  ;;  %v868_v18 = vld [vmem:[%s1720_s5] ss:$0 sm:$0xff]  ;;  %v580_v23 = vld [vmem:[#allocation8 + $0x78] sm:$0xff]  ;;  %v689_v45 = vld [vmem:[#allocation11 + $0x28] sm:$0xff] }
  0x86   :  { %v312_v25 = vsel %vm311_vm7, %v280_v19, %v310_v24  ;;  %v1187_v5 = vpack.c.bf16 %v570_v4, %v569_v3  ;;  %v1190_v8 = vpack.c.bf16 %v572_v7, %v571_v6  ;;  %v1193_v11 = vpack.c.bf16 %v574_v10, %v573_v9  ;;  %v688_v44 = vld [vmem:[#allocation11 + $0x20] sm:$0xff]  ;;  %v674_v47 = vld [vmem:[#allocation9 + $0x30] sm:$0xff]  ;;  %v675_v48 = vld [vmem:[#allocation9 + $0x38] sm:$0xff] }
  0x87   :  { %v314_v26 = vsel %vm313_vm8, %v281_v22, %v312_v25  ;;  %v1196_v14 = vpack.c.bf16 %v576_v13, %v575_v12  ;;  %v1199_v17 = vpack.c.bf16 %v578_v16, %v577_v15  ;;  %v579_v22 = vld [vmem:[#allocation8 + $0x70] sm:$0xff]  ;;  %v870_v25 = vld [vmem:[%s1722_s7] ss:$0 sm:$0xff]  ;;  %v691_v51 = vld [vmem:[#allocation11 + $0x38] sm:$0xff] }
  0x88   :  { %998 = vmatmul.mubr.msk.f32.vlgmr.msra.gmra.mrb[0].mxu0 %vm117_vm0, %v314_v26  ;;  %v1202_v24 = vpack.c.bf16 %v580_v23, %v579_v22  ;;  %v690_v50 = vld [vmem:[#allocation11 + $0x30] sm:$0xff]  ;;  %v676_v53 = vld [vmem:[#allocation9 + $0x40] sm:$0xff]  ;;  %v677_v54 = vld [vmem:[#allocation9 + $0x48] sm:$0xff] }
  0x89   :  { %1074 = vmatprep.mubr.msk.f32.mxu0 %vm1419_vm1, %v1420_v1  ;;  %1182 = vmatpush3.bf16.msra.mxu0 %v1181_v62  ;;  %v692_v56 = vld [vmem:[#allocation11 + $0x40] sm:$0xff]  ;;  %v693_v57 = vld [vmem:[#allocation11 + $0x48] sm:$0xff]  ;;  %v678_v59 = vld [vmem:[#allocation9 + $0x50] sm:$0xff] }
  0x8a   :  { %1183 = vmatprep.subr.bf16.mxu0 %v1418_v0  ;;  %v679_v60 = vld [vmem:[#allocation9 + $0x58] sm:$0xff]  ;;  %v694_v62 = vld [vmem:[#allocation11 + $0x50] sm:$0xff]  ;;  %v681_v4 = vld [vmem:[#allocation9 + $0x68] sm:$0xff] }
  0x8b   :  { %v1244_v61 = vpack.c.bf16 %v679_v60, %v678_v59  ;;  %v695_v63 = vld [vmem:[#allocation11 + $0x58] sm:$0xff]  ;;  %v697_v6 = vld [vmem:[#allocation11 + $0x68] sm:$0xff]  ;;  %v871_v15 = vld [vmem:[%s1724_s9] ss:$0 sm:$0xff] }
  0x8c   :  { %v1220_v3 = vpack.c.bf16 %v695_v63, %v694_v62  ;;  %v683_v9 = vld [vmem:[#allocation9 + $0x78] sm:$0xff] }
  0x8d   :  { %1185 = vmatpush3.bf16.msra.mxu0 %v1184_v2  ;;  %v680_v2 = vld [vmem:[#allocation9 + $0x60] sm:$0xff]  ;;  %v699_v12 = vld [vmem:[#allocation11 + $0x78] sm:$0xff] }
  0x8e   :  { %1186 = vmatprep.subr.bf16.mxu0 %v1418_v0  ;;  %v1247_v7 = vpack.c.bf16 %v681_v4, %v680_v2 }
  0x91   :  { %1188 = vmatpush3.bf16.msra.mxu0 %v1187_v5  ;;  %v696_v5 = vld [vmem:[#allocation11 + $0x60] sm:$0xff] }
  0x92   :  { %1189 = vmatprep.subr.bf16.mxu0 %v1418_v0  ;;  %v1223_v10 = vpack.c.bf16 %v697_v6, %v696_v5 }
  0x95   :  { %1191 = vmatpush3.bf16.msra.mxu0 %v1190_v8  ;;  %v682_v8 = vld [vmem:[#allocation9 + $0x70] sm:$0xff] }
  0x96   :  { %1192 = vmatprep.subr.bf16.mxu0 %v1418_v0  ;;  %v1250_v13 = vpack.c.bf16 %v683_v9, %v682_v8 }
  0x99   :  { %1194 = vmatpush3.bf16.msra.mxu0 %v1193_v11  ;;  %v698_v11 = vld [vmem:[#allocation11 + $0x70] sm:$0xff] }
  0x9a   :  { %1195 = vmatprep.subr.bf16.mxu0 %v1418_v0 }
  0x9d   :  { %1197 = vmatpush3.bf16.msra.mxu0 %v1196_v14  ;;  %v1226_v14 = vpack.c.bf16 %v699_v12, %v698_v11 }
  0x9e   :  { %1198 = vmatprep.subr.bf16.mxu0 %v1418_v0 }
  0xa1   :  { %1200 = vmatpush3.bf16.msra.mxu0 %v1199_v17 }
  0xa2   :  { %1201 = vmatprep.subr.bf16.mxu0 %v1418_v0 }
  0xa5   :  { %1203 = vmatpush3.bf16.msra.mxu0 %v1202_v24  ;;  %v666_v24 = vld [vmem:[%s1716_s1] sm:$0xff]  ;;  %s1379_s1 = scalar_lea.vmem %s856_s21, 128 }
  0xa6   :  { %1228 = vmatprep.subr.bf16.mxu0 %v1418_v0  ;;  %p1380_p12 = scmp.ne.s32.totalorder %s856_s21, %s1379_s1  ;;  %p1385_p0 = scmp.lt.s32.totalorder %s1379_s1, %s1379_s1 }
  0xa8   :  { %p1386_p1 = por %p1385_p0, %p1384_p13 }
  0xaa   :  { %p1387_p2 = pnand %p1386_p1, %p1380_p12 }
 0x15b   :  { %v383_v33 = vpop.f32.mrb[0].mxu0 }
 0x15c   :  { %v384_v34 = vadd.f32 %v866_v30, %v383_v33  ;;  %v999_v35 = vpop.f32.mrb[1].mxu0  ;;  %v668_v30 = vld [vmem:[#allocation9] sm:$0xff] }
 0x15d   :  { %v1229_v32 = vpack.c.bf16 %v669_v31, %v668_v30  ;;  %v684_v33 = vld [vmem:[#allocation11] sm:$0xff] }
 0x15e   :  { %v387_v37 = vmax.f32 %v384_v34, 0.0  ;;  %v685_v34 = vld [vmem:[#allocation11 + $0x8] sm:$0xff]  ;;  %v873_v30 = vld [vmem:[%s1727_s12] ss:$0 sm:$0xff] }
 0x15f   :  { %v1205_v35 = vpack.c.bf16 %v685_v34, %v684_v33 }
 0x160   :  { %1005 = vmatmul.mubr.msk.f32.vlgmr.msra.gmra.mrb[0].mxu1 %vm397_vm9, %v387_v37  ;;  %v671_v37 = vld [vmem:[#allocation9 + $0x18] sm:$0xff] }
 0x161   :  { %1158 = vmatpush3.bf16.msra.mxu1 %v1157_v36  ;;  %1039 = vmatprep.mubr.msk.f32.mxu1 %vm1419_vm1, %v1420_v1  ;;  %v670_v36 = vld [vmem:[#allocation9 + $0x10] sm:$0xff] }
 0x162   :  { %1159 = vmatprep.subr.bf16.mxu1 %v1418_v0  ;;  %v1232_v38 = vpack.c.bf16 %v671_v37, %v670_v36 }
 0x165   :  { %1161 = vmatpush3.bf16.msra.mxu1 %v1160_v40  ;;  %v687_v40 = vld [vmem:[#allocation11 + $0x18] sm:$0xff] }
 0x166   :  { %1162 = vmatprep.subr.bf16.mxu1 %v1418_v0  ;;  %v1208_v41 = vpack.c.bf16 %v687_v40, %v686_v39 }
 0x169   :  { %1164 = vmatpush3.bf16.msra.mxu1 %v1163_v43 }
 0x16a   :  { %1165 = vmatprep.subr.bf16.mxu1 %v1418_v0 }
 0x16d   :  { %1167 = vmatpush3.bf16.msra.mxu1 %v1166_v46  ;;  %v1211_v46 = vpack.c.bf16 %v689_v45, %v688_v44 }
 0x16e   :  { %1168 = vmatprep.subr.bf16.mxu1 %v1418_v0 }
 0x171   :  { %1170 = vmatpush3.bf16.msra.mxu1 %v1169_v49  ;;  %v1238_v49 = vpack.c.bf16 %v675_v48, %v674_v47 }
 0x172   :  { %1171 = vmatprep.subr.bf16.mxu1 %v1418_v0 }
 0x175   :  { %1173 = vmatpush3.bf16.msra.mxu1 %v1172_v52  ;;  %v1214_v52 = vpack.c.bf16 %v691_v51, %v690_v50 }
 0x176   :  { %1174 = vmatprep.subr.bf16.mxu1 %v1418_v0 }
 0x179   :  { %1176 = vmatpush3.bf16.msra.mxu1 %v1175_v55  ;;  %v1241_v55 = vpack.c.bf16 %v677_v54, %v676_v53 }
 0x17a   :  { %1177 = vmatprep.subr.bf16.mxu1 %v1418_v0 }
 0x17d   :  { %1179 = vmatpush3.bf16.msra.mxu1 %v1178_v58  ;;  %v1217_v58 = vpack.c.bf16 %v693_v57, %v692_v56 }
 0x17e   :  { %1204 = vmatprep.subr.bf16.mxu1 %v1418_v0 }
 0x233   :  { %v467_v19 = vpop.f32.mrb[0].mxu1 }
 0x234   :  { %v1668_v20 = vadd.f32 %v868_v18, %v467_v19  ;;  %v1006_v21 = vpop.f32.mrb[1].mxu1 }
 0x236   :  { %1040 = vmatmul.mubr.f32.vlgmr.msra.gmra.mrb[2].mxu1 %v1668_v20 }
 0x237   :  { %1109 = vmatprep.mubr.msk.f32.mxu1 %vm1419_vm1, %v1420_v1  ;;  %1206 = vmatpush3.bf16.msra.mxu1 %v1205_v35 }
 0x238   :  { %1207 = vmatprep.subr.bf16.mxu1 %v1418_v0 }
 0x23b   :  { %1209 = vmatpush3.bf16.msra.mxu1 %v1208_v41 }
 0x23c   :  { %1210 = vmatprep.subr.bf16.mxu1 %v1418_v0 }
 0x23f   :  { %1212 = vmatpush3.bf16.msra.mxu1 %v1211_v46 }
 0x240   :  { %1213 = vmatprep.subr.bf16.mxu1 %v1418_v0 }
 0x243   :  { %1215 = vmatpush3.bf16.msra.mxu1 %v1214_v52 }
 0x244   :  { %1216 = vmatprep.subr.bf16.mxu1 %v1418_v0 }
 0x247   :  { %1218 = vmatpush3.bf16.msra.mxu1 %v1217_v58 }
 0x248   :  { %1219 = vmatprep.subr.bf16.mxu1 %v1418_v0 }
 0x24b   :  { %1221 = vmatpush3.bf16.msra.mxu1 %v1220_v3 }
 0x24c   :  { %1222 = vmatprep.subr.bf16.mxu1 %v1418_v0 }
 0x24f   :  { %1224 = vmatpush3.bf16.msra.mxu1 %v1223_v10 }
 0x250   :  { %1225 = vmatprep.subr.bf16.mxu1 %v1418_v0 }
 0x253   :  { %1227 = vmatpush3.bf16.msra.mxu1 %v1226_v14 }
 0x309   :  { %v560_v26 = vpop.f32.mrb[2].mxu1 }
 0x30a   :  { %v561_v27 = vadd.f32 %v870_v25, %v560_v26  ;;  %v1041_v28 = vpop.f32.mrb[3].mxu1 }
 0x30c   :  { %v564_v29 = vmax.f32 %v561_v27, 0.0 }
 0x30e   :  { %1075 = vmatmul.mubr.f32.vlgmr.msra.gmra.mrb[2].mxu0 %v564_v29 }
 0x30f   :  { %1144 = vmatprep.mubr.msk.f32.mxu0 %vm1419_vm1, %v1420_v1  ;;  %1230 = vmatpush3.bf16.msra.mxu0 %v1229_v32  ;;  %v672_v1 = vld [vmem:[#allocation9 + $0x20] sm:$0xff] }
 0x310   :  { %1231 = vmatprep.subr.bf16.mxu0 %v1418_v0  ;;  %v1235_v43 = vpack.c.bf16 %v673_v42, %v672_v1 }
 0x313   :  { %1233 = vmatpush3.bf16.msra.mxu0 %v1232_v38 }
 0x314   :  { %1234 = vmatprep.subr.bf16.mxu0 %v1418_v0 }
 0x317   :  { %1236 = vmatpush3.bf16.msra.mxu0 %v1235_v43 }
 0x318   :  { %1237 = vmatprep.subr.bf16.mxu0 %v1418_v0 }
 0x31b   :  { %1239 = vmatpush3.bf16.msra.mxu0 %v1238_v49 }
 0x31c   :  { %1240 = vmatprep.subr.bf16.mxu0 %v1418_v0 }
 0x31f   :  { %1242 = vmatpush3.bf16.msra.mxu0 %v1241_v55 }
 0x320   :  { %1243 = vmatprep.subr.bf16.mxu0 %v1418_v0 }
 0x323   :  { %1245 = vmatpush3.bf16.msra.mxu0 %v1244_v61 }
 0x324   :  { %1246 = vmatprep.subr.bf16.mxu0 %v1418_v0 }
 0x327   :  { %1248 = vmatpush3.bf16.msra.mxu0 %v1247_v7 }
 0x328   :  { %1249 = vmatprep.subr.bf16.mxu0 %v1418_v0 }
 0x32b   :  { %1251 = vmatpush3.bf16.msra.mxu0 %v1250_v13 }
 0x3e1   :  { %v654_v16 = vpop.f32.mrb[2].mxu0 }
 0x3e2   :  { %v655_v17 = vadd.f32 %v871_v15, %v654_v16  ;;  %v1076_v18 = vpop.f32.mrb[3].mxu0 }
 0x3e4   :  { %v872_v19 = vmul.f32 -1.442695, %v655_v17 }
 0x3e6   :  { %1265 = vpow2.f32 %v872_v19 }
 0x3f0   :  { %v1266_v21 = vpop.eup %1265 }
 0x3f1   :  { %v661_v22 = vadd.f32 1.0, %v1266_v21 }
 0x3f3   :  { %1267 = vrcp.f32 %v661_v22 }
 0x3fd   :  { %v1268_v23 = vpop.eup %1267 }
 0x3fe   :  { %v664_v0 = vmul.f32 %v1268_v23, %v1668_v20  ;;  %v665_v25 = vsub.f32 1.0, %v1268_v23 }
 0x400   :  { %1145 = vmatmul.mubr.f32.vlgmr.msra.gmra.mrb[4].mxu0 %v664_v0  ;;  %v667_v26 = vmul.f32 %v666_v24, %v665_v25 }
 0x402   :  { %1110 = vmatmul.mubr.f32.vlgmr.msra.gmra.mrb[4].mxu1 %v667_v26 }
 0x4d3   :  { %v836_v27 = vpop.f32.mrb[4].mxu0 }
 0x4d4   :  { %v1146_v28 = vpop.f32.mrb[5].mxu0 }
 0x4d5   :  { %v766_v29 = vpop.f32.mrb[4].mxu1 }
 0x4d6   :  { %v837_v31 = vadd.f32 %v836_v27, %v766_v29  ;;  %v1111_v32 = vpop.f32.mrb[5].mxu1 }
 0x4d8   :  { %v847_v33 = vadd.f32 %v873_v30, %v837_v31 }
 0x4da   :  { %848 = vst [vmem:[#allocation12] sm:$0xff] %v847_v33 }
 0x4db   :  { %1390 = shalt.err (!%p1387_p2)
}
 0x4dc   :  { %s1391_s11 = scalar_lea.hbm %s1728_s13, 128 }
 0x4dd   :  { %p1392_p3 = scmp.ne.s32.totalorder %s1728_s13, %s1391_s11  ;;  %p1395_p4 = scmp.lt.u32.totalorder %s1391_s11, %s1728_s13 }
 0x4df   :  { %p1397_p5 = pnand %p1395_p4, %p1392_p3 }
 0x4e1   :  { %1400 = shalt.err (!%p1397_p5)
}
 0x4e2   :  { %858 = dma.vmem_to_hbm [thread:$0]  %s856_s21, 128, %s1728_s13, [#allocation5]  }
 0x4e3   :  { %1407 = dma.done.wait [#allocation5], 128  }
 0x4e4   :  { %1408 = vsyncadd [#allocation5], 4294967168 }
 0x4e5   :  { %862 = vsyncpa [#allocation4], 1 }
 0x4e6   :  { %863 = vsyncpa [#allocation7], 1 }
 0x4e7   :  { %864 = vsyncpa [#allocation10], 1 }
 0x4e8   :  { %865 = vsyncpa [#allocation5], 1 }

</bundles_post_ra>
